<compile_context>
chip_gen: v5e
topology: v5e:2x2
jax: 0.10.0
libtpu: 0.0.40
codegen_flags: <defaults>
</compile_context>

<pallas_src>
import functools

import jax
import jax.numpy as jnp
from jax.experimental import pallas as pl
from jax.experimental.pallas import tpu as pltpu

EPS = 1e-5


def bn_relu_kernel(x_ref, gb_ref, o_ref, *, inv_n, eps):
    # x_ref / o_ref : (C_blk, M) f32 in VMEM (channels on sublanes, M=N*H*W on lanes)
    # gb_ref        : (C_blk, 2) f32, column 0 = gamma, column 1 = beta
    c_blk, _ = x_ref.shape
    inv_n = jnp.float32(inv_n)
    eps = jnp.float32(eps)

    # Sub-slab of channels processed per iteration: keeps live vregs small
    # (128 x 49 f32 -> 16 vregs) so nothing spills.
    sub = 128 if (c_blk % 128 == 0) else c_blk
    n_sub = c_blk // sub

    def slab(i, carry):
        c0 = pl.multiple_of(i * sub, sub)
        s = pl.ds(c0, sub)

        # Pass 1: per-channel mean (x not kept live past this reduce).
        mean = jnp.sum(x_ref[s, :], axis=-1, keepdims=True) * inv_n     # (sub, 1)

        # Pass 2: center (fresh read), variance, normalize + affine + ReLU.
        xc = x_ref[s, :] - mean                                          # (sub, M)
        var = jnp.sum(xc * xc, axis=-1, keepdims=True) * inv_n           # biased var
        inv_std = jax.lax.rsqrt(var + eps)                               # EUP rsqrt

        gb = gb_ref[s, :]                                                # (sub, 2)
        scale = gb[:, 0:1] * inv_std                                     # gamma / std
        o_ref[s, :] = jnp.maximum(xc * scale + gb[:, 1:2], 0.0)
        return carry

    jax.lax.fori_loop(0, n_sub, slab, 0, unroll=True)


def batchnorm_relu(x_nchw, gamma, beta, eps=EPS):
    """Training-mode BatchNorm2d (batch statistics) + ReLU.

    x_nchw: (N, C, H, W) float32; gamma, beta: (C,) float32.
    """
    N, C, H, W = x_nchw.shape
    M = N * H * W

    # Channels-major 2D view. For N == 1 this is a free reshape (no transpose).
    if N == 1:
        x2d = x_nchw.reshape(C, M)
    else:
        x2d = jnp.transpose(x_nchw, (1, 0, 2, 3)).reshape(C, M)

    # Pack gamma/beta into one tiny (C, 2) parameter array -> single DMA.
    gb = jnp.stack([gamma, beta], axis=1).astype(jnp.float32)

    # 2-way channel grid when it splits cleanly (v7x megacore); else 1 block.
    n_blk = 2 if (C % 2 == 0 and (C // 2) % 8 == 0) else 1
    c_blk = C // n_blk

    kernel = functools.partial(bn_relu_kernel, inv_n=1.0 / M, eps=eps)

    out2d = pl.pallas_call(
        kernel,
        out_shape=jax.ShapeDtypeStruct((C, M), jnp.float32),
        grid=(n_blk,),
        in_specs=[
            pl.BlockSpec((c_blk, M), lambda i: (i, 0)),
            pl.BlockSpec((c_blk, 2), lambda i: (i, 0)),
        ],
        out_specs=pl.BlockSpec((c_blk, M), lambda i: (i, 0)),
        compiler_params=pltpu.CompilerParams(
            dimension_semantics=("parallel",)),
    )(x2d, gb)

    if N == 1:
        return out2d.reshape(N, C, H, W)
    return jnp.transpose(out2d.reshape(C, N, H, W), (1, 0, 2, 3))


if __name__ == "__main__":
    # Shapes consistent with the module: x398 = randn([1, 768, 7, 7])
    N, C, H, W = 1, 768, 7, 7
    key = jax.random.PRNGKey(0)
    kx, kg, kb = jax.random.split(key, 3)

    x = jax.random.normal(kx, (N, C, H, W), dtype=jnp.float32)
    # Non-trivial affine params to exercise the gamma/beta path
    # (PyTorch default init is weight=1, bias=0; same forward function).
    gamma = 1.0 + 0.1 * jax.random.normal(kg, (C,), dtype=jnp.float32)
    beta = 0.1 * jax.random.normal(kb, (C,), dtype=jnp.float32)

    out = jax.block_until_ready(batchnorm_relu(x, gamma, beta))

    # Pure-JAX reference (training-mode BN + ReLU).
    mean = jnp.mean(x, axis=(0, 2, 3), keepdims=True)
    var = jnp.mean((x - mean) ** 2, axis=(0, 2, 3), keepdims=True)
    ref = jnp.maximum(
        (x - mean) * jax.lax.rsqrt(var + EPS)
        * gamma.reshape(1, C, 1, 1) + beta.reshape(1, C, 1, 1),
        0.0,
    )
    assert out.shape == (N, C, H, W)
    assert jnp.allclose(out, ref, atol=1e-4, rtol=1e-4)

    print("KERNEL_OK")
</pallas_src>

<mosaic_0001>
module attributes {stable_mosaic.version = 11 : i64} {
  func.func @bn_relu_kernel(%arg0: i32, %arg1: memref<384x49xf32, #tpu.memory_space<vmem>>, %arg2: memref<384x2xf32, #tpu.memory_space<vmem>>, %arg3: memref<384x49xf32, #tpu.memory_space<vmem>>) attributes {dimension_semantics = [#tpu.dimension_semantics<parallel>], iteration_bounds = array<i64: 2>, scalar_prefetch = 0 : i64, scratch_operands = 0 : i64, tpu.core_type = #tpu.core_type<tc>, window_params = [{transform_indices = @transform_0, window_bounds = array<i64: 384, 49>}, {transform_indices = @transform_1, window_bounds = array<i64: 384, 2>}, {transform_indices = @transform_2, window_bounds = array<i64: 384, 49>}]} {
    %cst = arith.constant 0.0204081628 : f32
    %cst_0 = arith.constant 9.99999974E-6 : f32
    %c0_i32 = arith.constant 0 : i32
    %c128_i32 = arith.constant 128 : i32
    %0 = arith.muli %c0_i32, %c128_i32 : i32
    %1 = tpu.assume_multiple %0, 128 : i32
    %2 = arith.index_cast %1 : i32 to index
    %c0 = arith.constant 0 : index
    %3 = vector.load %arg1[%2, %c0] : memref<384x49xf32, #tpu.memory_space<vmem>>, vector<128x49xf32>
    %cst_1 = arith.constant dense<0.000000e+00> : vector<128xf32>
    %4 = vector.multi_reduction <add>, %3, %cst_1 [1] : vector<128x49xf32> to vector<128xf32>
    %5 = vector.shape_cast %4 : vector<128xf32> to vector<128x1xf32>
    %6 = vector.broadcast %cst : f32 to vector<128x1xf32>
    %7 = arith.mulf %5, %6 : vector<128x1xf32>
    %8 = arith.index_cast %1 : i32 to index
    %c0_2 = arith.constant 0 : index
    %9 = vector.load %arg1[%8, %c0_2] : memref<384x49xf32, #tpu.memory_space<vmem>>, vector<128x49xf32>
    %10 = vector.broadcast %7 : vector<128x1xf32> to vector<128x49xf32>
    %11 = arith.subf %9, %10 : vector<128x49xf32>
    %12 = arith.mulf %11, %11 : vector<128x49xf32>
    %cst_3 = arith.constant dense<0.000000e+00> : vector<128xf32>
    %13 = vector.multi_reduction <add>, %12, %cst_3 [1] : vector<128x49xf32> to vector<128xf32>
    %14 = vector.shape_cast %13 : vector<128xf32> to vector<128x1xf32>
    %15 = vector.broadcast %cst : f32 to vector<128x1xf32>
    %16 = arith.mulf %14, %15 : vector<128x1xf32>
    %17 = vector.broadcast %cst_0 : f32 to vector<128x1xf32>
    %18 = arith.addf %16, %17 : vector<128x1xf32>
    %19 = math.rsqrt %18 : vector<128x1xf32>
    %20 = arith.index_cast %1 : i32 to index
    %c0_4 = arith.constant 0 : index
    %21 = vector.load %arg2[%20, %c0_4] : memref<384x2xf32, #tpu.memory_space<vmem>>, vector<128x2xf32>
    %22 = vector.extract_strided_slice %21 {offsets = [0, 0], sizes = [128, 1], strides = [1, 1]} : vector<128x2xf32> to vector<128x1xf32>
    %23 = arith.mulf %22, %19 : vector<128x1xf32>
    %24 = vector.broadcast %23 : vector<128x1xf32> to vector<128x49xf32>
    %25 = arith.mulf %11, %24 : vector<128x49xf32>
    %26 = vector.extract_strided_slice %21 {offsets = [0, 1], sizes = [128, 1], strides = [1, 1]} : vector<128x2xf32> to vector<128x1xf32>
    %27 = vector.broadcast %26 : vector<128x1xf32> to vector<128x49xf32>
    %28 = arith.addf %25, %27 : vector<128x49xf32>
    %cst_5 = arith.constant 0.000000e+00 : f32
    %29 = vector.broadcast %cst_5 : f32 to vector<128x49xf32>
    %30 = arith.maximumf %28, %29 : vector<128x49xf32>
    %31 = arith.index_cast %1 : i32 to index
    %c0_6 = arith.constant 0 : index
    %32 = vector.load %arg3[%31, %c0_6] : memref<384x49xf32, #tpu.memory_space<vmem>>, vector<128x49xf32>
    tpu.vector_store %arg3[%31, %c0_6], %30 {strides = array<i32>} : memref<384x49xf32, #tpu.memory_space<vmem>>, vector<128x49xf32>,
    %c1_i32 = arith.constant 1 : i32
    %c128_i32_7 = arith.constant 128 : i32
    %33 = arith.muli %c1_i32, %c128_i32_7 : i32
    %34 = tpu.assume_multiple %33, 128 : i32
    %35 = arith.index_cast %34 : i32 to index
    %c0_8 = arith.constant 0 : index
    %36 = vector.load %arg1[%35, %c0_8] : memref<384x49xf32, #tpu.memory_space<vmem>>, vector<128x49xf32>
    %cst_9 = arith.constant dense<0.000000e+00> : vector<128xf32>
    %37 = vector.multi_reduction <add>, %36, %cst_9 [1] : vector<128x49xf32> to vector<128xf32>
    %38 = vector.shape_cast %37 : vector<128xf32> to vector<128x1xf32>
    %39 = vector.broadcast %cst : f32 to vector<128x1xf32>
    %40 = arith.mulf %38, %39 : vector<128x1xf32>
    %41 = arith.index_cast %34 : i32 to index
    %c0_10 = arith.constant 0 : index
    %42 = vector.load %arg1[%41, %c0_10] : memref<384x49xf32, #tpu.memory_space<vmem>>, vector<128x49xf32>
    %43 = vector.broadcast %40 : vector<128x1xf32> to vector<128x49xf32>
    %44 = arith.subf %42, %43 : vector<128x49xf32>
    %45 = arith.mulf %44, %44 : vector<128x49xf32>
    %cst_11 = arith.constant dense<0.000000e+00> : vector<128xf32>
    %46 = vector.multi_reduction <add>, %45, %cst_11 [1] : vector<128x49xf32> to vector<128xf32>
    %47 = vector.shape_cast %46 : vector<128xf32> to vector<128x1xf32>
    %48 = vector.broadcast %cst : f32 to vector<128x1xf32>
    %49 = arith.mulf %47, %48 : vector<128x1xf32>
    %50 = vector.broadcast %cst_0 : f32 to vector<128x1xf32>
    %51 = arith.addf %49, %50 : vector<128x1xf32>
    %52 = math.rsqrt %51 : vector<128x1xf32>
    %53 = arith.index_cast %34 : i32 to index
    %c0_12 = arith.constant 0 : index
    %54 = vector.load %arg2[%53, %c0_12] : memref<384x2xf32, #tpu.memory_space<vmem>>, vector<128x2xf32>
    %55 = vector.extract_strided_slice %54 {offsets = [0, 0], sizes = [128, 1], strides = [1, 1]} : vector<128x2xf32> to vector<128x1xf32>
    %56 = arith.mulf %55, %52 : vector<128x1xf32>
    %57 = vector.broadcast %56 : vector<128x1xf32> to vector<128x49xf32>
    %58 = arith.mulf %44, %57 : vector<128x49xf32>
    %59 = vector.extract_strided_slice %54 {offsets = [0, 1], sizes = [128, 1], strides = [1, 1]} : vector<128x2xf32> to vector<128x1xf32>
    %60 = vector.broadcast %59 : vector<128x1xf32> to vector<128x49xf32>
    %61 = arith.addf %58, %60 : vector<128x49xf32>
    %cst_13 = arith.constant 0.000000e+00 : f32
    %62 = vector.broadcast %cst_13 : f32 to vector<128x49xf32>
    %63 = arith.maximumf %61, %62 : vector<128x49xf32>
    %64 = arith.index_cast %34 : i32 to index
    %c0_14 = arith.constant 0 : index
    %65 = vector.load %arg3[%64, %c0_14] : memref<384x49xf32, #tpu.memory_space<vmem>>, vector<128x49xf32>
    tpu.vector_store %arg3[%64, %c0_14], %63 {strides = array<i32>} : memref<384x49xf32, #tpu.memory_space<vmem>>, vector<128x49xf32>,
    %c2_i32 = arith.constant 2 : i32
    %c128_i32_15 = arith.constant 128 : i32
    %66 = arith.muli %c2_i32, %c128_i32_15 : i32
    %67 = tpu.assume_multiple %66, 128 : i32
    %68 = arith.index_cast %67 : i32 to index
    %c0_16 = arith.constant 0 : index
    %69 = vector.load %arg1[%68, %c0_16] : memref<384x49xf32, #tpu.memory_space<vmem>>, vector<128x49xf32>
    %cst_17 = arith.constant dense<0.000000e+00> : vector<128xf32>
    %70 = vector.multi_reduction <add>, %69, %cst_17 [1] : vector<128x49xf32> to vector<128xf32>
    %71 = vector.shape_cast %70 : vector<128xf32> to vector<128x1xf32>
    %72 = vector.broadcast %cst : f32 to vector<128x1xf32>
    %73 = arith.mulf %71, %72 : vector<128x1xf32>
    %74 = arith.index_cast %67 : i32 to index
    %c0_18 = arith.constant 0 : index
    %75 = vector.load %arg1[%74, %c0_18] : memref<384x49xf32, #tpu.memory_space<vmem>>, vector<128x49xf32>
    %76 = vector.broadcast %73 : vector<128x1xf32> to vector<128x49xf32>
    %77 = arith.subf %75, %76 : vector<128x49xf32>
    %78 = arith.mulf %77, %77 : vector<128x49xf32>
    %cst_19 = arith.constant dense<0.000000e+00> : vector<128xf32>
    %79 = vector.multi_reduction <add>, %78, %cst_19 [1] : vector<128x49xf32> to vector<128xf32>
    %80 = vector.shape_cast %79 : vector<128xf32> to vector<128x1xf32>
    %81 = vector.broadcast %cst : f32 to vector<128x1xf32>
    %82 = arith.mulf %80, %81 : vector<128x1xf32>
    %83 = vector.broadcast %cst_0 : f32 to vector<128x1xf32>
    %84 = arith.addf %82, %83 : vector<128x1xf32>
    %85 = math.rsqrt %84 : vector<128x1xf32>
    %86 = arith.index_cast %67 : i32 to index
    %c0_20 = arith.constant 0 : index
    %87 = vector.load %arg2[%86, %c0_20] : memref<384x2xf32, #tpu.memory_space<vmem>>, vector<128x2xf32>
    %88 = vector.extract_strided_slice %87 {offsets = [0, 0], sizes = [128, 1], strides = [1, 1]} : vector<128x2xf32> to vector<128x1xf32>
    %89 = arith.mulf %88, %85 : vector<128x1xf32>
    %90 = vector.broadcast %89 : vector<128x1xf32> to vector<128x49xf32>
    %91 = arith.mulf %77, %90 : vector<128x49xf32>
    %92 = vector.extract_strided_slice %87 {offsets = [0, 1], sizes = [128, 1], strides = [1, 1]} : vector<128x2xf32> to vector<128x1xf32>
    %93 = vector.broadcast %92 : vector<128x1xf32> to vector<128x49xf32>
    %94 = arith.addf %91, %93 : vector<128x49xf32>
    %cst_21 = arith.constant 0.000000e+00 : f32
    %95 = vector.broadcast %cst_21 : f32 to vector<128x49xf32>
    %96 = arith.maximumf %94, %95 : vector<128x49xf32>
    %97 = arith.index_cast %67 : i32 to index
    %c0_22 = arith.constant 0 : index
    %98 = vector.load %arg3[%97, %c0_22] : memref<384x49xf32, #tpu.memory_space<vmem>>, vector<128x49xf32>
    tpu.vector_store %arg3[%97, %c0_22], %96 {strides = array<i32>} : memref<384x49xf32, #tpu.memory_space<vmem>>, vector<128x49xf32>,
    %c3_i32 = arith.constant 3 : i32
    return
  }
  func.func @transform_0(%arg0: i32) -> (i32, i32) {
    %c0_i32 = arith.constant 0 : i32
    %c0_i32_0 = arith.constant 0 : i32
    return %arg0, %c0_i32 : i32, i32
  }
  func.func @transform_1(%arg0: i32) -> (i32, i32) {
    %c0_i32 = arith.constant 0 : i32
    %c0_i32_0 = arith.constant 0 : i32
    return %arg0, %c0_i32 : i32, i32
  }
  func.func @transform_2(%arg0: i32) -> (i32, i32) {
    %c0_i32 = arith.constant 0 : i32
    %c0_i32_0 = arith.constant 0 : i32
    return %arg0, %c0_i32 : i32, i32
  }
}

</mosaic_0001>

<bundles_post_ra>
// kernel: tpu_custom_call.1
= control target key start
LH: loop header
LB: loop body
LE: loop exit
PB: predicated region body
PF: predicated region fallthrough
CT: control target
= control target key end

     0   :  { %s2329_s9 = smov 0   ;;  %s4147_s0 = inlined_call_operand.vmem [shape: f32[768,49], index: 0, kind: input, shape index: {}]   ;;  %s4148_s1 = inlined_call_operand.vmem [shape: f32[768,2], index: 1, kind: input, shape index: {}]   ;;  %s4149_s2 = inlined_call_operand.vmem [shape: f32[768,49], index: 2, kind: output, shape index: {}]  }
   0x1 LB: > { %s2068_s10 = sadd.s32 4294967295, %s2310_s9   ;;  %p2072_p0 = scmp.ge.s32.totalorder %s2310_s9, 1  ;;  %s2310_s9 = sphi %s2329_s9, %s12_s9  }
   0x2   : > { %p124_p1 = scmp.lt.s32.totalorder %s2310_s9, 3 }
   0x4   : > { %p125_p2 = pnand %p2072_p0, %p124_p1 }
   0x6   : > { %128 = sbr.rel (%p125_p2) target bundleno = 1012 (0x3f4), region = 28 }
   0xb   : > { %s151_s11 = smul.u32 48, %s2068_s10  ;;  %vm185_vm0 = vcmask 400384  }
   0xd   : > { %p152_p3 = scmp.lt.s32.totalorder %s151_s11, 95 }
   0xf   : > { %s4364_s11 = smov (!%p152_p3, %s151_s11), 95 }
  0x10   : > { %s2337_s12 = sshll.u32 %s4364_s11, 3 }
  0x11   : > { %s2343_s15 = scalar_lea.vmem %s4147_s0, %s2337_s12  ;;  %s2726_s18 = scalar_lea.vmem %s4148_s1, %s2337_s12 }
  0x12   : > { %v2346_v0 = vld [vmem:[%s2343_s15 + $0x20] sm:$0xff]  ;;  %v2349_v1 = vld [vmem:[%s2343_s15 + $0x10] sm:$0xff]  ;;  %v2361_v6 = vld [vmem:[%s2343_s15 + $0x28] sm:$0xff]  ;;  %s3514_s21 = scalar_lea.vmem %s4149_s2, %s2337_s12 }
  0x13   : > { %v2352_v2 = vld [vmem:[%s2343_s15] sm:$0xff]  ;;  %v198_v3 = vsel %vm185_vm0, %v2346_v0, 0.0  ;;  %v192_v4 = vsel %vm185_vm0, %v2349_v1, 0.0  ;;  %v2364_v7 = vld [vmem:[%s2343_s15 + $0x18] sm:$0xff]  ;;  %v2367_v8 = vld [vmem:[%s2343_s15 + $0x8] sm:$0xff]  ;;  %v201_v9 = vsel %vm185_vm0, %v2361_v6, 0.0 }
  0x14   : > { %v186_v5 = vsel %vm185_vm0, %v2352_v2, 0.0  ;;  %199 = vadd.xlane.f32.xlu2 %v198_v3  ;;  %193 = vadd.xlane.f32.xlu1 %v192_v4  ;;  %v195_v10 = vsel %vm185_vm0, %v2364_v7, 0.0  ;;  %v189_v11 = vsel %vm185_vm0, %v2367_v8, 0.0  ;;  %v2376_v12 = vld [vmem:[%s2343_s15 + $0x40] sm:$0xff]  ;;  %v2379_v13 = vld [vmem:[%s2343_s15 + $0x38] sm:$0xff]  ;;  %v2382_v14 = vld [vmem:[%s2343_s15 + $0x30] sm:$0xff] }
  0x15   : > { %187 = vadd.xlane.f32.xlu0 %v186_v5  ;;  %v210_v15 = vsel %vm185_vm0, %v2376_v12, 0.0  ;;  %v207_v16 = vsel %vm185_vm0, %v2379_v13, 0.0  ;;  %v204_v17 = vsel %vm185_vm0, %v2382_v14, 0.0  ;;  %v2391_v18 = vld [vmem:[%s2343_s15 + $0x58] sm:$0xff]  ;;  %v2394_v19 = vld [vmem:[%s2343_s15 + $0x50] sm:$0xff]  ;;  %v2397_v20 = vld [vmem:[%s2343_s15 + $0x48] sm:$0xff] }
  0x16   : > { %v219_v21 = vsel %vm185_vm0, %v2391_v18, 0.0  ;;  %v216_v22 = vsel %vm185_vm0, %v2394_v19, 0.0  ;;  %v213_v23 = vsel %vm185_vm0, %v2397_v20, 0.0  ;;  %v2406_v24 = vld [vmem:[%s2343_s15 + $0x70] sm:$0xff]  ;;  %v2409_v25 = vld [vmem:[%s2343_s15 + $0x68] sm:$0xff]  ;;  %v2412_v26 = vld [vmem:[%s2343_s15 + $0x60] sm:$0xff] }
  0x17   : > { %v228_v27 = vsel %vm185_vm0, %v2406_v24, 0.0  ;;  %v225_v28 = vsel %vm185_vm0, %v2409_v25, 0.0  ;;  %v222_v29 = vsel %vm185_vm0, %v2412_v26, 0.0  ;;  %v2421_v30 = vld [vmem:[%s2343_s15 + $0x88] sm:$0xff]  ;;  %v2424_v31 = vld [vmem:[%s2343_s15 + $0x80] sm:$0xff]  ;;  %v2427_v32 = vld [vmem:[%s2343_s15 + $0x78] sm:$0xff] }
  0x18   : > { %v798_v33 = vsel %vm185_vm0, %v2421_v30, 0.0  ;;  %v795_v34 = vsel %vm185_vm0, %v2424_v31, 0.0  ;;  %v231_v35 = vsel %vm185_vm0, %v2427_v32, 0.0  ;;  %v2436_v36 = vld [vmem:[%s2343_s15 + $0xa0] sm:$0xff]  ;;  %v2439_v37 = vld [vmem:[%s2343_s15 + $0x98] sm:$0xff]  ;;  %v2442_v38 = vld [vmem:[%s2343_s15 + $0x90] sm:$0xff] }
  0x19   : > { %v807_v39 = vsel %vm185_vm0, %v2436_v36, 0.0  ;;  %v804_v40 = vsel %vm185_vm0, %v2439_v37, 0.0  ;;  %v801_v41 = vsel %vm185_vm0, %v2442_v38, 0.0  ;;  %v2451_v42 = vld [vmem:[%s2343_s15 + $0xb0] sm:$0xff]  ;;  %v2456_v44 = vld [vmem:[%s2343_s15 + $0xa8] sm:$0xff] }
  0x1a   : > { %v813_v43 = vsel %vm185_vm0, %v2451_v42, 0.0  ;;  %v810_v45 = vsel %vm185_vm0, %v2456_v44, 0.0 }
  0x1c   : > { %202 = vadd.xlane.f32.xlu2 %v201_v9  ;;  %196 = vadd.xlane.f32.xlu1 %v195_v10 }
  0x1d   : > { %190 = vadd.xlane.f32.xlu0 %v189_v11 }
  0x24   : > { %211 = vadd.xlane.f32.xlu2 %v210_v15  ;;  %208 = vadd.xlane.f32.xlu1 %v207_v16 }
  0x25   : > { %205 = vadd.xlane.f32.xlu0 %v204_v17 }
  0x2c   : > { %220 = vadd.xlane.f32.xlu2 %v219_v21  ;;  %217 = vadd.xlane.f32.xlu1 %v216_v22 }
  0x2d   : > { %214 = vadd.xlane.f32.xlu0 %v213_v23 }
  0x34   : > { %229 = vadd.xlane.f32.xlu2 %v228_v27  ;;  %226 = vadd.xlane.f32.xlu1 %v225_v28 }
  0x35   : > { %223 = vadd.xlane.f32.xlu0 %v222_v29 }
  0x3c   : > { %799 = vadd.xlane.f32.xlu1 %v798_v33  ;;  %796 = vadd.xlane.f32.xlu2 %v795_v34 }
  0x3d   : > { %232 = vadd.xlane.f32.xlu0 %v231_v35 }
  0x44   : > { %808 = vadd.xlane.f32.xlu1 %v807_v39  ;;  %805 = vadd.xlane.f32.xlu2 %v804_v40 }
  0x45   : > { %802 = vadd.xlane.f32.xlu0 %v801_v41 }
  0x4c   : > { %811 = vadd.xlane.f32.xlu2 %v810_v45 }
  0x4d   : > { %814 = vadd.xlane.f32.xlu0 %v813_v43 }
  0x87   : > { %v200_v46 = vpop.xlane.xlu2 %199  ;;  %v194_v47 = vpop.xlane.xlu1 %193 }
  0x88   : > { %v236_v48 = vmul.f32 0.020408163, %v194_v47  ;;  %v188_v49 = vpop.xlane.xlu0 %187 }
  0x89   : > { %v234_v50 = vmul.f32 0.020408163, %v188_v49 }
  0x8a   : > { %v2461_v51 = vsub.f32 %v2349_v1, %v236_v48 }
  0x8b   : > { %v2464_v52 = vsub.f32 %v2352_v2, %v234_v50  ;;  %v238_v2 = vmul.f32 0.020408163, %v200_v46 }
  0x8c   : > { %v268_v53 = vmul.f32 %v2461_v51, %v2461_v51 }
  0x8d   : > { %4188 = vst [vmem:[#allocation2_spill] sm:$0xff] %v2464_v52  ;;  %v266_v54 = vmul.f32 %v2464_v52, %v2464_v52 }
  0x8e   : > { %v288_v55 = vsel %vm185_vm0, %v268_v53, 0.0 }
  0x8f   : > { %v203_v56 = vpop.xlane.xlu2 %202  ;;  %v197_v57 = vpop.xlane.xlu1 %196  ;;  %289 = vadd.xlane.f32.xlu0 %v288_v55  ;;  %v282_v58 = vsel %vm185_vm0, %v266_v54, 0.0 }
  0x90   : > { %v239_v59 = vmul.f32 0.020408163, %v203_v56  ;;  %v237_v60 = vmul.f32 0.020408163, %v197_v57  ;;  %283 = vadd.xlane.f32.xlu1 %v282_v58  ;;  %v191_v61 = vpop.xlane.xlu0 %190 }
  0x91   : > { %v235_v62 = vmul.f32 0.020408163, %v191_v61 }
  0x92   : > { %v2473_v63 = vsub.f32 %v2361_v6, %v239_v59  ;;  %v2476_v1 = vsub.f32 %v2364_v7, %v237_v60  ;;  %v2490_v7 = vsub.f32 %v2346_v0, %v238_v2 }
  0x93   : > { %v2479_v3 = vsub.f32 %v2367_v8, %v235_v62 }
  0x94   : > { %4189 = vst [vmem:[#allocation3_spill] sm:$0xff] %v2473_v63  ;;  %v271_v4 = vmul.f32 %v2473_v63, %v2473_v63  ;;  %v269_v5 = vmul.f32 %v2476_v1, %v2476_v1  ;;  %v270_v0 = vmul.f32 %v2490_v7, %v2490_v7 }
  0x95   : > { %4190 = vst [vmem:[#allocation4_spill] sm:$0xff] %v2476_v1  ;;  %v267_v9 = vmul.f32 %v2479_v3, %v2479_v3 }
  0x96   : > { %4191 = vst [vmem:[#allocation5_spill] sm:$0xff] %v2479_v3  ;;  %v297_v10 = vsel %vm185_vm0, %v271_v4, 0.0  ;;  %v291_v6 = vsel %vm185_vm0, %v269_v5, 0.0 }
  0x97   : > { %4192 = vst [vmem:[#allocation6_spill] sm:$0xff] %v2490_v7  ;;  %v212_v11 = vpop.xlane.xlu2 %211  ;;  %298 = vadd.xlane.f32.xlu0 %v297_v10  ;;  %v285_v8 = vsel %vm185_vm0, %v267_v9, 0.0  ;;  %v209_v15 = vpop.xlane.xlu1 %208 }
  0x98   : > { %v242_v16 = vmul.f32 0.020408163, %v212_v11  ;;  %292 = vadd.xlane.f32.xlu1 %v291_v6  ;;  %286 = vadd.xlane.f32.xlu2 %v285_v8  ;;  %v206_v17 = vpop.xlane.xlu0 %205  ;;  %v241_v22 = vmul.f32 0.020408163, %v209_v15  ;;  %v2548_v6 = vld [vmem:[%s2343_s15 + $0xc8] sm:$0xff] }
  0x99   : > { %v240_v21 = vmul.f32 0.020408163, %v206_v17  ;;  %v822_v8 = vsel %vm185_vm0, %v2548_v6, 0.0 }
  0x9a   : > { %v2494_v23 = vsub.f32 %v2376_v12, %v242_v16  ;;  %v2506_v33 = vsub.f32 %v2379_v13, %v241_v22  ;;  %v294_v12 = vsel %vm185_vm0, %v270_v0, 0.0  ;;  %v2568_v22 = vld [vmem:[%s2343_s15 + $0xc0] sm:$0xff] }
  0x9b   : > { %v2497_v27 = vsub.f32 %v2382_v14, %v240_v21  ;;  %v2562_v21 = vld [vmem:[%s2343_s15 + $0xe0] sm:$0xff] }
  0x9c   : > { %4193 = vst [vmem:[#allocation7_spill] sm:$0xff] %v2494_v23  ;;  %v274_v28 = vmul.f32 %v2494_v23, %v2494_v23  ;;  %v273_v46 = vmul.f32 %v2506_v33, %v2506_v33  ;;  %v831_v0 = vsel %vm185_vm0, %v2562_v21, 0.0 }
  0x9d   : > { %4194 = vst [vmem:[#allocation8_spill] sm:$0xff] %v2497_v27  ;;  %v272_v29 = vmul.f32 %v2497_v27, %v2497_v27 }
  0x9e   : > { %4195 = vst [vmem:[#allocation9_spill] sm:$0xff] %v2506_v33  ;;  %v306_v34 = vsel %vm185_vm0, %v274_v28, 0.0  ;;  %v303_v53 = vsel %vm185_vm0, %v273_v46, 0.0 }
  0x9f   : > { %v221_v35 = vpop.xlane.xlu2 %220  ;;  %307 = vadd.xlane.f32.xlu0 %v306_v34  ;;  %v300_v14 = vsel %vm185_vm0, %v272_v29, 0.0  ;;  %v218_v39 = vpop.xlane.xlu1 %217  ;;  %v819_v29 = vsel %vm185_vm0, %v2568_v22, 0.0 }
  0xa0   : > { %v245_v40 = vmul.f32 0.020408163, %v221_v35  ;;  %295 = vadd.xlane.f32.xlu2 %v294_v12  ;;  %301 = vadd.xlane.f32.xlu1 %v300_v14  ;;  %v215_v41 = vpop.xlane.xlu0 %214  ;;  %v244_v45 = vmul.f32 0.020408163, %v218_v39  ;;  %v2577_v12 = vld [vmem:[%s2343_s15 + $0xf8] sm:$0xff]  ;;  %v2580_v14 = vld [vmem:[%s2343_s15 + $0xd0] sm:$0xff] }
  0xa1   : > { %v243_v43 = vmul.f32 0.020408163, %v215_v41  ;;  %v2583_v39 = vld [vmem:[%s2343_s15 + $0xd8] sm:$0xff]  ;;  %v825_v46 = vsel %vm185_vm0, %v2580_v14, 0.0 }
  0xa2   : > { %v2514_v13 = vsub.f32 %v2391_v18, %v245_v40  ;;  %v2524_v50 = vsub.f32 %v2394_v19, %v244_v45  ;;  %v840_v40 = vsel %vm185_vm0, %v2577_v12, 0.0 }
  0xa3   : > { %v2517_v47 = vsub.f32 %v2397_v20, %v243_v43 }
  0xa4   : > { %4196 = vst [vmem:[#allocation10_spill] sm:$0xff] %v2514_v13  ;;  %v277_v48 = vmul.f32 %v2514_v13, %v2514_v13  ;;  %v276_v19 = vmul.f32 %v2524_v50, %v2524_v50 }
  0xa5   : > { %4197 = vst [vmem:[#allocation11_spill] sm:$0xff] %v2517_v47  ;;  %v275_v49 = vmul.f32 %v2517_v47, %v2517_v47 }
  0xa6   : > { %4198 = vst [vmem:[#allocation12_spill] sm:$0xff] %v2524_v50  ;;  %v315_v54 = vsel %vm185_vm0, %v277_v48, 0.0  ;;  %v312_v5 = vsel %vm185_vm0, %v276_v19, 0.0  ;;  %v828_v48 = vsel %vm185_vm0, %v2583_v39, 0.0 }
  0xa7   : > { %v230_v55 = vpop.xlane.xlu2 %229  ;;  %316 = vadd.xlane.f32.xlu0 %v315_v54  ;;  %v309_v18 = vsel %vm185_vm0, %v275_v49, 0.0  ;;  %v227_v56 = vpop.xlane.xlu1 %226 }
  0xa8   : > { %v248_v20 = vmul.f32 0.020408163, %v230_v55  ;;  %310 = vadd.xlane.f32.xlu1 %v309_v18  ;;  %v224_v57 = vpop.xlane.xlu0 %223  ;;  %304 = vadd.xlane.f32.xlu2 %v303_v53  ;;  %v247_v59 = vmul.f32 0.020408163, %v227_v56  ;;  %v2597_v55 = vld [vmem:[%s2343_s15 + $0xe8] sm:$0xff]  ;;  %v2600_v18 = vld [vmem:[%s2343_s15 + $0xf0] sm:$0xff] }
  0xa9   : > { %v246_v58 = vmul.f32 0.020408163, %v224_v57  ;;  %v834_v56 = vsel %vm185_vm0, %v2597_v55, 0.0  ;;  %v837_v57 = vsel %vm185_vm0, %v2600_v18, 0.0 }
  0xaa   : > { %v2532_v60 = vsub.f32 %v2406_v24, %v248_v20  ;;  %v2542_v4 = vsub.f32 %v2409_v25, %v247_v59 }
  0xab   : > { %v2535_v61 = vsub.f32 %v2412_v26, %v246_v58 }
  0xac   : > { %4199 = vst [vmem:[#allocation13_spill] sm:$0xff] %v2532_v60  ;;  %v280_v62 = vmul.f32 %v2532_v60, %v2532_v60  ;;  %v279_v25 = vmul.f32 %v2542_v4, %v2542_v4 }
  0xad   : > { %4200 = vst [vmem:[#allocation14_spill] sm:$0xff] %v2535_v61  ;;  %v278_v2 = vmul.f32 %v2535_v61, %v2535_v61 }
  0xae   : > { %4201 = vst [vmem:[#allocation15_spill] sm:$0xff] %v2542_v4  ;;  %v324_v9 = vsel %vm185_vm0, %v280_v62, 0.0  ;;  %v321_v16 = vsel %vm185_vm0, %v279_v25, 0.0 }
  0xaf   : > { %325 = vadd.xlane.f32.xlu0 %v324_v9  ;;  %v318_v24 = vsel %vm185_vm0, %v278_v2, 0.0  ;;  %v800_v41 = vpop.xlane.xlu1 %799  ;;  %v797_v43 = vpop.xlane.xlu2 %796 }
  0xb0   : > { %319 = vadd.xlane.f32.xlu1 %v318_v24  ;;  %v233_v26 = vpop.xlane.xlu0 %232  ;;  %313 = vadd.xlane.f32.xlu2 %v312_v5  ;;  %v844_v53 = vmul.f32 0.020408163, %v800_v41  ;;  %v843_v54 = vmul.f32 0.020408163, %v797_v43 }
  0xb1   : > { %v249_v10 = vmul.f32 0.020408163, %v233_v26 }
  0xb2   : > { %v2606_v20 = vsub.f32 %v2421_v30, %v844_v53  ;;  %v2611_v58 = vsub.f32 %v2424_v31, %v843_v54 }
  0xb3   : > { %v2553_v11 = vsub.f32 %v2427_v32, %v249_v10  ;;  %v2565_v32 = vld [vmem:[%s2343_s15 + $0xb8] sm:$0xff] }
  0xb4   : > { %v816_v28 = vsel %vm185_vm0, %v2565_v32, 0.0  ;;  %4204 = vst [vmem:[#allocation18_spill] sm:$0xff] %v2606_v20  ;;  %v876_v2 = vmul.f32 %v2606_v20, %v2606_v20  ;;  %v875_v30 = vmul.f32 %v2611_v58, %v2611_v58  ;;  %v2103_v20 = vld [vmem:[%s2726_s18 + $0xd8] sm:$0xff] }
  0xb5   : > { %4202 = vst [vmem:[#allocation16_spill] sm:$0xff] %v2553_v11  ;;  %v281_v15 = vmul.f32 %v2553_v11, %v2553_v11  ;;  %v2818_v11 = vld [vmem:[%s2726_s18 + $0xe8] sm:$0xff] }
  0xb6   : > { %4205 = vst [vmem:[#allocation19_spill] sm:$0xff] %v2611_v58  ;;  %v894_v24 = vsel %vm185_vm0, %v876_v2, 0.0  ;;  %v891_v26 = vsel %vm185_vm0, %v875_v30, 0.0 }
  0xb7   : > { %823 = vadd.xlane.f32.xlu0 %v822_v8  ;;  %v327_v17 = vsel %vm185_vm0, %v281_v15, 0.0  ;;  %v809_v59 = vpop.xlane.xlu1 %808  ;;  %v806_v19 = vpop.xlane.xlu2 %805 }
  0xb8   : > { %328 = vadd.xlane.f32.xlu1 %v327_v17  ;;  %322 = vadd.xlane.f32.xlu2 %v321_v16  ;;  %v803_v34 = vpop.xlane.xlu0 %802  ;;  %v847_v62 = vmul.f32 0.020408163, %v809_v59  ;;  %v846_v5 = vmul.f32 0.020408163, %v806_v19 }
  0xb9   : > { %v845_v35 = vmul.f32 0.020408163, %v803_v34 }
  0xba   : > { %v2618_v9 = vsub.f32 %v2436_v36, %v847_v62  ;;  %v2622_v31 = vsub.f32 %v2439_v37, %v846_v5  ;;  %v4150_v5 = vmov 1  }
  0xbb   : > { %v2588_v45 = vsub.f32 %v2442_v38, %v845_v35  ;;  %2185 = vset.pattern.permute.xlu1 %v4150_v5  ;;  %2184 = vset.pattern.permute.xlu2 %v4150_v5  ;;  %v2793_v5 = vld [vmem:[%s2726_s18 + $0xa0] sm:$0xff] }
  0xbc   : > { %4206 = vst [vmem:[#allocation20_spill] sm:$0xff] %v2618_v9  ;;  %v879_v25 = vmul.f32 %v2618_v9, %v2618_v9  ;;  %v878_v8 = vmul.f32 %v2622_v31, %v2622_v31 }
  0xbd   : > { %4203 = vst [vmem:[#allocation17_spill] sm:$0xff] %v2588_v45  ;;  %v877_v49 = vmul.f32 %v2588_v45, %v2588_v45 }
  0xbe   : > { %4207 = vst [vmem:[#allocation21_spill] sm:$0xff] %v2622_v31  ;;  %v903_v36 = vsel %vm185_vm0, %v879_v25, 0.0  ;;  %v900_v16 = vsel %vm185_vm0, %v878_v8, 0.0 }
  0xbf   : > { %832 = vadd.xlane.f32.xlu0 %v831_v0  ;;  %v897_v38 = vsel %vm185_vm0, %v877_v49, 0.0 }
  0xc0   : > { %817 = vadd.xlane.f32.xlu1 %v816_v28  ;;  %820 = vadd.xlane.f32.xlu2 %v819_v29  ;;  %v815_v10 = vpop.xlane.xlu0 %814 }
  0xc1   : > { %v849_v15 = vmul.f32 0.020408163, %v815_v10 }
  0xc3   : > { %v2632_v17 = vsub.f32 %v2451_v42, %v849_v15 }
  0xc5   : > { %4208 = vst [vmem:[#allocation22_spill] sm:$0xff] %v2632_v17  ;;  %v881_v37 = vmul.f32 %v2632_v17, %v2632_v17 }
  0xc7   : > { %841 = vadd.xlane.f32.xlu0 %v840_v40  ;;  %v909_v0 = vsel %vm185_vm0, %v881_v37, 0.0  ;;  %v812_v40 = vpop.xlane.xlu2 %811 }
  0xc8   : > { %826 = vadd.xlane.f32.xlu1 %v825_v46  ;;  %829 = vadd.xlane.f32.xlu2 %v828_v48  ;;  %v848_v54 = vmul.f32 0.020408163, %v812_v40 }
  0xcf   : > { %898 = vadd.xlane.f32.xlu0 %v897_v38 }
  0xd0   : > { %835 = vadd.xlane.f32.xlu1 %v834_v56  ;;  %838 = vadd.xlane.f32.xlu2 %v837_v57  ;;  %v2662_v56 = vsub.f32 %v2456_v44, %v848_v54 }
  0xd2   : > { %4209 = vst [vmem:[#allocation23_spill] sm:$0xff] %v2662_v56  ;;  %v880_v2 = vmul.f32 %v2662_v56, %v2662_v56 }
  0xd4   : > { %v906_v44 = vsel %vm185_vm0, %v880_v2, 0.0 }
  0xd7   : > { %907 = vadd.xlane.f32.xlu0 %v906_v44 }
  0xd8   : > { %895 = vadd.xlane.f32.xlu2 %v894_v24  ;;  %892 = vadd.xlane.f32.xlu1 %v891_v26 }
  0xe0   : > { %904 = vadd.xlane.f32.xlu2 %v903_v36  ;;  %901 = vadd.xlane.f32.xlu1 %v900_v16 }
  0xe8   : > { %910 = vadd.xlane.f32.xlu1 %v909_v0 }
 0x102   : > { %v2637_v28 = vpop.xlane.xlu0 %289 }
 0x103   : > { %v2639_v29 = vpop.xlane.xlu1 %283 }
 0x10a   : > { %v2641_v34 = vpop.xlane.xlu0 %298 }
 0x10b   : > { %v2643_v35 = vpop.xlane.xlu1 %292  ;;  %v2649_v43 = vpop.xlane.xlu2 %286 }
 0x112   : > { %v2645_v41 = vpop.xlane.xlu0 %307 }
 0x113   : > { %v2647_v42 = vpop.xlane.xlu1 %301  ;;  %v2655_v49 = vpop.xlane.xlu2 %295 }
 0x11a   : > { %v2651_v46 = vpop.xlane.xlu0 %316 }
 0x11b   : > { %v2653_v48 = vpop.xlane.xlu1 %310  ;;  %v2664_v57 = vpop.xlane.xlu2 %304 }
 0x122   : > { %v2657_v53 = vpop.xlane.xlu0 %325 }
 0x123   : > { %v2659_v38 = vpop.xlane.xlu1 %319  ;;  %v2679_v25 = vpop.xlane.xlu2 %313 }
 0x12a   : > { %v824_v59 = vpop.xlane.xlu0 %823 }
 0x12b   : > { %v2666_v19 = vpop.xlane.xlu1 %328  ;;  %v852_v62 = vmul.f32 0.020408163, %v824_v59  ;;  %v2693_v44 = vpop.xlane.xlu2 %322 }
 0x12d   : > { %v2673_v30 = vsub.f32 %v2548_v6, %v852_v62 }
 0x12f   : > { %4210 = vst [vmem:[#allocation24_spill] sm:$0xff] %v2673_v30  ;;  %v884_v24 = vmul.f32 %v2673_v30, %v2673_v30  ;;  %v2807_v30 = vld [vmem:[%s2726_s18 + $0xd0] sm:$0xff] }
 0x131   : > { %v918_v26 = vsel %vm185_vm0, %v884_v24, 0.0 }
 0x132   : > { %919 = vadd.xlane.f32.xlu1 %v918_v26  ;;  %v833_v10 = vpop.xlane.xlu0 %832 }
 0x133   : > { %v818_v8 = vpop.xlane.xlu1 %817  ;;  %v855_v15 = vmul.f32 0.020408163, %v833_v10 }
 0x134   : > { %v850_v36 = vmul.f32 0.020408163, %v818_v8 }
 0x135   : > { %v2682_v16 = vsub.f32 %v2562_v21, %v855_v15 }
 0x136   : > { %v2685_v6 = vsub.f32 %v2565_v32, %v850_v36 }
 0x137   : > { %4211 = vst [vmem:[#allocation25_spill] sm:$0xff] %v2682_v16  ;;  %v887_v37 = vmul.f32 %v2682_v16, %v2682_v16  ;;  %v2100_v16 = vld [vmem:[%s2726_s18 + $0xc0] sm:$0xff] }
 0x138   : > { %4212 = vst [vmem:[#allocation26_spill] sm:$0xff] %v2685_v6  ;;  %v882_v0 = vmul.f32 %v2685_v6, %v2685_v6 }
 0x139   : > { %v927_v40 = vsel %vm185_vm0, %v887_v37, 0.0 }
 0x13a   : > { %v912_v54 = vsel %vm185_vm0, %v882_v0, 0.0  ;;  %928 = vadd.xlane.f32.xlu1 %v927_v40  ;;  %v842_v59 = vpop.xlane.xlu0 %841 }
 0x13b   : > { %913 = vadd.xlane.f32.xlu2 %v912_v54  ;;  %v827_v62 = vpop.xlane.xlu1 %826  ;;  %v858_v2 = vmul.f32 0.020408163, %v842_v59 }
 0x13c   : > { %v853_v21 = vmul.f32 0.020408163, %v827_v62 }
 0x13d   : > { %v2696_v32 = vsub.f32 %v2577_v12, %v858_v2 }
 0x13e   : > { %v2699_v24 = vsub.f32 %v2580_v14, %v853_v21  ;;  %v821_v14 = vpop.xlane.xlu2 %820 }
 0x13f   : > { %4213 = vst [vmem:[#allocation27_spill] sm:$0xff] %v2696_v32  ;;  %v890_v26 = vmul.f32 %v2696_v32, %v2696_v32  ;;  %v851_v54 = vmul.f32 0.020408163, %v821_v14  ;;  %v525_v14 = vld [vmem:[%s2726_s18 + $0x18] sm:$0xff] }
 0x140   : > { %4214 = vst [vmem:[#allocation28_spill] sm:$0xff] %v2699_v24  ;;  %v885_v10 = vmul.f32 %v2699_v24, %v2699_v24  ;;  %v2099_v32 = vld [vmem:[%s2726_s18 + $0xb8] sm:$0xff]  ;;  %v2106_v24 = vld [vmem:[%s2726_s18 + $0xf0] sm:$0xff] }
 0x141   : > { %v936_v8 = vsel %vm185_vm0, %v890_v26, 0.0  ;;  %v2714_v59 = vsub.f32 %v2568_v22, %v851_v54  ;;  %v526_v54 = vld [vmem:[%s2726_s18 + $0x20] sm:$0xff] }
 0x142   : > { %v921_v15 = vsel %vm185_vm0, %v885_v10, 0.0  ;;  %937 = vadd.xlane.f32.xlu1 %v936_v8  ;;  %v522_v10 = vld [vmem:[%s2726_s18] sm:$0xff]  ;;  %v2809_v17 = vpop.xlane.xlu0 %898 }
 0x143   : > { %922 = vadd.xlane.f32.xlu2 %v921_v15  ;;  %v836_v36 = vpop.xlane.xlu1 %835  ;;  %4216 = vst [vmem:[#allocation30_spill] sm:$0xff] %v2714_v59  ;;  %v883_v21 = vmul.f32 %v2714_v59, %v2714_v59 }
 0x144   : > { %v856_v37 = vmul.f32 0.020408163, %v836_v36 }
 0x145   : > { %v915_v26 = vsel %vm185_vm0, %v883_v21, 0.0  ;;  %v2754_v21 = vld [vmem:[%s2726_s18 + $0x38] sm:$0xff] }
 0x146   : > { %v2708_v12 = vsub.f32 %v2597_v55, %v856_v37  ;;  %v830_v62 = vpop.xlane.xlu2 %829  ;;  %916 = vadd.xlane.f32.xlu0 %v915_v26  ;;  %v2736_v37 = vld [vmem:[%s2726_s18 + $0x10] sm:$0xff]  ;;  %v530_v26 = vld [vmem:[%s2726_s18 + $0x40] sm:$0xff] }
 0x147   : > { %v854_v2 = vmul.f32 0.020408163, %v830_v62  ;;  %v2745_v62 = vld [vmem:[%s2726_s18 + $0x28] sm:$0xff] }
 0x148   : > { %4215 = vst [vmem:[#allocation29_spill] sm:$0xff] %v2708_v12  ;;  %v888_v0 = vmul.f32 %v2708_v12, %v2708_v12 }
 0x149   : > { %v2720_v55 = vsub.f32 %v2583_v39, %v854_v2 }
 0x14a   : > { %v930_v40 = vsel %vm185_vm0, %v888_v0, 0.0  ;;  %v908_v61 = vpop.xlane.xlu0 %907 }
 0x14b   : > { %931 = vadd.xlane.f32.xlu2 %v930_v40  ;;  %4217 = vst [vmem:[#allocation31_spill] sm:$0xff] %v2720_v55  ;;  %v886_v15 = vmul.f32 %v2720_v55, %v2720_v55  ;;  %v944_v3 = vmul.f32 0.020408163, %v908_v61 }
 0x14d   : > { %v924_v39 = vsel %vm185_vm0, %v886_v15, 0.0  ;;  %v533_v15 = vld [vmem:[%s2726_s18 + $0x58] sm:$0xff]  ;;  %v960_v6 = vadd.f32 1e-05, %v944_v3 }
 0x14e   : > { %v839_v22 = vpop.xlane.xlu2 %838  ;;  %925 = vadd.xlane.f32.xlu0 %v924_v39  ;;  %v2769_v39 = vld [vmem:[%s2343_s15 + $0x140] sm:$0xff] }
 0x14f   : > { %v857_v8 = vmul.f32 0.020408163, %v839_v22  ;;  %v2759_v22 = vld [vmem:[%s2343_s15 + $0x128] sm:$0xff]  ;;  %vm1027_vm7 = vweird.f32 %v960_v6 }
 0x151   : > { %v2733_v36 = vsub.f32 %v2600_v18, %v857_v8  ;;  %v2749_v18 = vld [vmem:[%s2343_s15 + $0x110] sm:$0xff] }
 0x152   : > { %v1412_v2 = vsel %vm185_vm0, %v2749_v18, 0.0  ;;  %v2764_v8 = vld [vmem:[%s2726_s18 + $0x50] sm:$0xff] }
 0x153   : > { %4218 = vst [vmem:[#allocation32_spill] sm:$0xff] %v2733_v36  ;;  %v889_v0 = vmul.f32 %v2733_v36, %v2733_v36 }
 0x155   : > { %v933_v40 = vsel %vm185_vm0, %v889_v0, 0.0  ;;  %v2774_v0 = vld [vmem:[%s2726_s18 + $0x68] sm:$0xff] }
 0x156   : > { %934 = vadd.xlane.f32.xlu0 %v933_v40  ;;  %v536_v40 = vld [vmem:[%s2726_s18 + $0x70] sm:$0xff] }
 0x15b   : > { %652 = vperm.xlu1 %2185, %v522_v10   ;;  %v1421_v10 = vsel %vm185_vm0, %v2759_v22, 0.0 }
 0x15e   : > { %1413 = vadd.xlane.f32.xlu0 %v1412_v2 }
 0x163   : > { %662 = vperm.xlu2 %2184, %v2736_v37   ;;  %667 = vperm.xlu1 %2185, %v525_v14   ;;  %v1430_v14 = vsel %vm185_vm0, %v2769_v39, 0.0 }
 0x166   : > { %1422 = vadd.xlane.f32.xlu0 %v1421_v10  ;;  %v2785_v10 = vld [vmem:[%s2726_s18 + $0x90] sm:$0xff] }
 0x16b   : > { %672 = vperm.xlu2 %2184, %v526_v54   ;;  %677 = vperm.xlu1 %2185, %v2745_v62   ;;  %v2779_v54 = vld [vmem:[%s2343_s15 + $0x158] sm:$0xff] }
 0x16c   : > { %v1439_v2 = vsel %vm185_vm0, %v2779_v54, 0.0 }
 0x16e   : > { %1431 = vadd.xlane.f32.xlu0 %v1430_v14  ;;  %v2790_v14 = vld [vmem:[%s2343_s15 + $0x170] sm:$0xff] }
 0x173   : > { %687 = vperm.xlu2 %2184, %v2754_v21   ;;  %692 = vperm.xlu1 %2185, %v530_v26   ;;  %v2092_v26 = vld [vmem:[%s2726_s18 + $0x80] sm:$0xff] }
 0x176   : > { %1440 = vadd.xlane.f32.xlu0 %v1439_v2  ;;  %v2799_v2 = vld [vmem:[%s2726_s18 + $0xa8] sm:$0xff] }
 0x17b   : > { %702 = vperm.xlu2 %2184, %v2764_v8   ;;  %707 = vperm.xlu1 %2185, %v533_v15   ;;  %v2095_v15 = vld [vmem:[%s2726_s18 + $0x98] sm:$0xff] }
 0x183   : > { %717 = vperm.xlu2 %2184, %v2774_v0   ;;  %722 = vperm.xlu1 %2185, %v536_v40   ;;  %v1448_v40 = vsel %vm185_vm0, %v2790_v14, 0.0 }
 0x184   : > { %1449 = vadd.xlane.f32.xlu0 %v1448_v40 }
 0x18b   : > { %1262 = vperm.xlu2 %2184, %v2092_v26   ;;  %1272 = vperm.xlu1 %2185, %v2785_v10   ;;  %v2803_v26 = vpop.xlane.xlu2 %895 }
 0x193   : > { %1277 = vperm.xlu2 %2184, %v2095_v15   ;;  %1282 = vperm.xlu1 %2185, %v2793_v5   ;;  %v2812_v15 = vpop.xlane.xlu1 %892  ;;  %v2814_v40 = vpop.xlane.xlu2 %904 }
 0x19b   : > { %1287 = vperm.xlu2 %2184, %v2799_v2   ;;  %1297 = vperm.xlu1 %2185, %v2099_v32   ;;  %v2821_v47 = vpop.xlane.xlu1 %901 }
 0x1a3   : > { %1302 = vperm.xlu2 %2184, %v2100_v16   ;;  %1312 = vperm.xlu1 %2185, %v2807_v30   ;;  %v2824_v31 = vpop.xlane.xlu1 %910 }
 0x1ab   : > { %1317 = vperm.xlu2 %2184, %v2103_v20   ;;  %1327 = vperm.xlu1 %2185, %v2818_v11   ;;  %v2826_v7 = vpop.xlane.xlu1 %919 }
 0x1ae   : > { %v914_v27 = vpop.xlane.xlu2 %913 }
 0x1af   : > { %v946_v12 = vmul.f32 0.020408163, %v914_v27 }
 0x1b1   : > { %v962_v16 = vadd.f32 1e-05, %v946_v12 }
 0x1b3   : > { %2192 = vrsqrt.f32 %v962_v16  ;;  %1332 = vperm.xlu2 %2184, %v2106_v24   ;;  %vm1047_vm2 = vweird.f32 %v962_v16 }
 0x1b4   : > { %2194 = vrsqrt.f32 %v960_v6 }
 0x1b6   : > { %v923_v56 = vpop.xlane.xlu2 %922 }
 0x1b7   : > { %v949_v36 = vmul.f32 0.020408163, %v923_v56 }
 0x1b9   : > { %v2193_v55 = vpop.eup %2192  ;;  %v965_v20 = vadd.f32 1e-05, %v949_v36 }
 0x1ba   : > { %v1042_v58 = vmul.f32 %v2193_v55, %v962_v16  ;;  %v2195_v59 = vpop.eup %2194  ;;  %vm1048_vm1 = vweird.f32 %v2193_v55 }
 0x1bb   : > { %2196 = vrsqrt.f32 %v965_v20  ;;  %v1022_v27 = vmul.f32 %v2195_v59, %v960_v6  ;;  %vm1049_vm3 = vmor %vm1047_vm2, %vm1048_vm1  ;;  %vm1077_vm5 = vweird.f32 %v965_v20  ;;  %vm1028_vm8 = vweird.f32 %v2195_v59 }
 0x1bc   : > { %v1043_v60 = vmul.f32 %v2193_v55, %v1042_v58  ;;  %vm1029_vm10 = vmor %vm1027_vm7, %vm1028_vm8 }
 0x1bd   : > { %v1023_v36 = vmul.f32 %v2195_v59, %v1022_v27 }
 0x1be   : > { %v1044_v13 = vmul.f32 0.5, %v1043_v60  ;;  %v932_v23 = vpop.xlane.xlu2 %931 }
 0x1bf   : > { %v952_v61 = vmul.f32 0.020408163, %v932_v23  ;;  %v1024_v58 = vmul.f32 0.5, %v1023_v36  ;;  %v2851_v36 = vld [vmem:[%s2343_s15 + $0x108] sm:$0xff] }
 0x1c0   : > { %v1045_v3 = vsub.f32 1.5, %v1044_v13  ;;  %v2830_v13 = vpop.xlane.xlu1 %928 }
 0x1c1   : > { %v2197_v24 = vpop.eup %2196  ;;  %v968_v12 = vadd.f32 1e-05, %v952_v61  ;;  %v1025_v16 = vsub.f32 1.5, %v1024_v58 }
 0x1c2   : > { %v1046_v1 = vmul.f32 %v2193_v55, %v1045_v3  ;;  %v1072_v56 = vmul.f32 %v2197_v24, %v965_v20  ;;  %vm1078_vm4 = vweird.f32 %v2197_v24 }
 0x1c3   : > { %2198 = vrsqrt.f32 %v968_v12  ;;  %vm1079_vm6 = vmor %vm1077_vm5, %vm1078_vm4  ;;  %vm1107_vm11 = vweird.f32 %v968_v12 }
 0x1c4   : > { %v1073_v52 = vmul.f32 %v2197_v24, %v1072_v56  ;;  %v1050_v9 = vsel %vm1049_vm3, %v2193_v55, %v1046_v1  ;;  %v2832_v1 = vpop.xlane.xlu0 %916  ;;  %v2838_v55 = vld [vmem:[%s2343_s15 + $0x100] sm:$0xff] }
 0x1c5   : > { %v2828_v45 = vmul.f32 %v2099_v32, %v1050_v9  ;;  %v1026_v32 = vmul.f32 %v2195_v59, %v1025_v16 }
 0x1c6   : > { %v1074_v60 = vmul.f32 0.5, %v1073_v52 }
 0x1c7   : > { %4219 = vst [vmem:[#allocation33_spill] sm:$0xff] %v2828_v45  ;;  %v1030_v6 = vsel %vm1029_vm10, %v2195_v59, %v1026_v32  ;;  %v1409_v59 = vsel %vm185_vm0, %v2851_v36, 0.0  ;;  %v2881_v32 = vld [vmem:[%s2343_s15 + $0x138] sm:$0xff] }
 0x1c8   : > { %v1075_v23 = vsub.f32 1.5, %v1074_v60 }
 0x1c9   : > { %v2199_v4 = vpop.eup %2198 }
 0x1ca   : > { %v1076_v50 = vmul.f32 %v2197_v24, %v1075_v23  ;;  %v1102_v61 = vmul.f32 %v2199_v4, %v968_v12  ;;  %vm1108_vm9 = vweird.f32 %v2199_v4  ;;  %v2854_v12 = vld [vmem:[%s2343_s15 + $0x118] sm:$0xff] }
 0x1cb   : > { %vm1109_vm12 = vmor %vm1107_vm11, %vm1108_vm9 }
 0x1cc   : > { %v1103_v3 = vmul.f32 %v2199_v4, %v1102_v61  ;;  %v1080_v33 = vsel %vm1079_vm6, %v2197_v24, %v1076_v50  ;;  %v1406_v50 = vsel %vm185_vm0, %v2838_v55, 0.0  ;;  %v2856_v60 = vpop.xlane.xlu0 %925 }
 0x1cd   : > { %v2835_v52 = vmul.f32 %v2807_v30, %v1080_v33  ;;  %v2842_v33 = vpop.xlane.xlu1 %937  ;;  %v2845_v30 = vmul.f32 %v2799_v2, %v1030_v6  ;;  %v1415_v2 = vsel %vm185_vm0, %v2854_v12, 0.0 }
 0x1ce   : > { %v1104_v9 = vmul.f32 0.5, %v1103_v3  ;;  %v2876_v3 = vpop.permute.xlu2 %662 }
 0x1cf   : > { %4220 = vst [vmem:[#allocation34_spill] sm:$0xff] %v2835_v52 }
 0x1d0   : > { %v1105_v27 = vsub.f32 1.5, %v1104_v9  ;;  %4221 = vst [vmem:[#allocation35_spill] sm:$0xff] %v2845_v30 }
 0x1d1   : > { %4224 = vst [vmem:[#allocation38_spill] sm:$0xff] %v2876_v3 }
 0x1d2   : > { %v1106_v20 = vmul.f32 %v2199_v4, %v1105_v27  ;;  %v2884_v27 = vld [vmem:[%s2343_s15 + $0x148] sm:$0xff] }
 0x1d4   : > { %v1110_v24 = vsel %vm1109_vm12, %v2199_v4, %v1106_v20  ;;  %v2865_v4 = vld [vmem:[%s2343_s15 + $0x120] sm:$0xff]  ;;  %v2872_v61 = vpop.xlane.xlu0 %934  ;;  %v1427_v20 = vsel %vm185_vm0, %v2881_v32, 0.0 }
 0x1d5   : > { %1407 = vadd.xlane.f32.xlu1 %v1406_v50  ;;  %v2848_v56 = vmul.f32 %v2818_v11, %v1110_v24  ;;  %v2862_v58 = vpop.permute.xlu1 %652  ;;  %v2868_v11 = vld [vmem:[%s2343_s15 + $0x130] sm:$0xff]  ;;  %v1418_v23 = vsel %vm185_vm0, %v2865_v4, 0.0  ;;  %v1433_v50 = vsel %vm185_vm0, %v2884_v27, 0.0 }
 0x1d6   : > { %4223 = vst [vmem:[#allocation37_spill] sm:$0xff] %v2862_v58  ;;  %v1424_v16 = vsel %vm185_vm0, %v2868_v11, 0.0  ;;  %v2890_v24 = vpop.permute.xlu2 %672 }
 0x1d7   : > { %4222 = vst [vmem:[#allocation36_spill] sm:$0xff] %v2848_v56  ;;  %v2905_v56 = vld [vmem:[%s2343_s15 + $0x168] sm:$0xff] }
 0x1d8   : > { %4226 = vst [vmem:[#allocation40_spill] sm:$0xff] %v2890_v24  ;;  %v1445_v52 = vsel %vm185_vm0, %v2905_v56, 0.0 }
 0x1dc   : > { %1410 = vadd.xlane.f32.xlu2 %v1409_v59  ;;  %v1414_v6 = vpop.xlane.xlu0 %1413  ;;  %v2893_v59 = vld [vmem:[%s2343_s15 + $0x150] sm:$0xff] }
 0x1dd   : > { %1416 = vadd.xlane.f32.xlu1 %v1415_v2  ;;  %v2878_v9 = vpop.permute.xlu1 %667  ;;  %v2896_v2 = vld [vmem:[%s2343_s15 + $0x160] sm:$0xff] }
 0x1de   : > { %4225 = vst [vmem:[#allocation39_spill] sm:$0xff] %v2878_v9  ;;  %v1442_v9 = vsel %vm185_vm0, %v2896_v2, 0.0  ;;  %v2907_v24 = vpop.permute.xlu2 %687 }
 0x1df   : > { %4228 = vst [vmem:[#allocation42_spill] sm:$0xff] %v2907_v24 }
 0x1e4   : > { %1419 = vadd.xlane.f32.xlu2 %v1418_v23  ;;  %v1423_v58 = vpop.xlane.xlu0 %1422 }
 0x1e5   : > { %1425 = vadd.xlane.f32.xlu1 %v1424_v16  ;;  %v2898_v23 = vpop.permute.xlu1 %677  ;;  %v1436_v16 = vsel %vm185_vm0, %v2893_v59, 0.0 }
 0x1e6   : > { %4227 = vst [vmem:[#allocation41_spill] sm:$0xff] %v2898_v23  ;;  %v2923_v24 = vpop.permute.xlu2 %702 }
 0x1ec   : > { %1428 = vadd.xlane.f32.xlu2 %v1427_v20  ;;  %v1456_v20 = vmul.f32 0.020408163, %v1414_v6  ;;  %v1459_v6 = vmul.f32 0.020408163, %v1423_v58 }
 0x1ed   : > { %1434 = vadd.xlane.f32.xlu1 %v1433_v50  ;;  %v2910_v50 = vld [vmem:[%s2343_s15 + $0x178] sm:$0xff]  ;;  %v2914_v45 = vpop.permute.xlu1 %692 }
 0x1ee   : > { %4229 = vst [vmem:[#allocation43_spill] sm:$0xff] %v2914_v45  ;;  %v1451_v30 = vsel %vm185_vm0, %v2910_v50, 0.0  ;;  %v2919_v23 = vsub.f32 %v2749_v18, %v1456_v20  ;;  %v2927_v3 = vsub.f32 %v2759_v22, %v1459_v6 }
 0x1f0   : > { %4230 = vst [vmem:[#allocation44_spill] sm:$0xff] %v2919_v23  ;;  %v1491_v18 = vmul.f32 %v2927_v3, %v2927_v3 }
 0x1f1   : > { %4231 = vst [vmem:[#allocation45_spill] sm:$0xff] %v2927_v3 }
 0x1f2   : > { %v1517_v20 = vsel %vm185_vm0, %v1491_v18, 0.0  ;;  %v332_v18 = vmul.f32 0.020408163, %v2637_v28 }
 0x1f4   : > { %1437 = vadd.xlane.f32.xlu2 %v1436_v16  ;;  %v1432_v16 = vpop.xlane.xlu0 %1431 }
 0x1f5   : > { %1443 = vadd.xlane.f32.xlu1 %v1442_v9  ;;  %v1488_v9 = vmul.f32 %v2919_v23, %v2919_v23  ;;  %v2929_v45 = vpop.permute.xlu1 %707 }
 0x1f6   : > { %4232 = vst [vmem:[#allocation46_spill] sm:$0xff] %v2929_v45 }
 0x1f7   : > { %v1508_v63 = vsel %vm185_vm0, %v1488_v9, 0.0  ;;  %v2937_v9 = vpop.permute.xlu2 %717 }
 0x1f8   : > { %4234 = vst [vmem:[#allocation48_spill] sm:$0xff] %v2937_v9 }
 0x1fc   : > { %1446 = vadd.xlane.f32.xlu2 %v1445_v52  ;;  %v1462_v52 = vmul.f32 0.020408163, %v1432_v16  ;;  %v1441_v58 = vpop.xlane.xlu0 %1440 }
 0x1fd   : > { %1452 = vadd.xlane.f32.xlu1 %v1451_v30  ;;  %v2313_v30 = vmov 0   ;;  %v2939_v22 = vpop.permute.xlu1 %722  ;;  %v1465_v6 = vmul.f32 0.020408163, %v1441_v58 }
 0x1fe   : > { %2187 = vset.pattern.permute.xlu1 %v2313_v30  ;;  %2186 = vset.pattern.permute.xlu0 %v2313_v30  ;;  %v2935_v23 = vsub.f32 %v2769_v39, %v1462_v52  ;;  %4235 = vst [vmem:[#allocation49_spill] sm:$0xff] %v2939_v22 }
 0x1ff   : > { %2188 = vset.pattern.permute.xlu2 %v2313_v30  ;;  %v2945_v3 = vsub.f32 %v2779_v54, %v1465_v6  ;;  %v2948_v45 = vpop.permute.xlu2 %1262  ;;  %v335_v54 = vmul.f32 0.020408163, %v2641_v34 }
 0x200   : > { %4233 = vst [vmem:[#allocation47_spill] sm:$0xff] %v2935_v23 }
 0x201   : > { %4236 = vst [vmem:[#allocation50_spill] sm:$0xff] %v2945_v3  ;;  %v1497_v39 = vmul.f32 %v2945_v3, %v2945_v3 }
 0x202   : > { %4237 = vst [vmem:[#allocation51_spill] sm:$0xff] %v2948_v45 }
 0x203   : > { %v1535_v58 = vsel %vm185_vm0, %v1497_v39, 0.0  ;;  %v337_v39 = vmul.f32 0.020408163, %v2664_v57 }
 0x204   : > { %v1450_v30 = vpop.xlane.xlu0 %1449 }
 0x205   : > { %1509 = vadd.xlane.f32.xlu1 %v1508_v63  ;;  %v1494_v63 = vmul.f32 %v2935_v23, %v2935_v23  ;;  %v1468_v52 = vmul.f32 0.020408163, %v1450_v30  ;;  %v2952_v22 = vpop.permute.xlu1 %1272 }
 0x206   : > { %4238 = vst [vmem:[#allocation52_spill] sm:$0xff] %v2952_v22 }
 0x207   : > { %v1526_v16 = vsel %vm185_vm0, %v1494_v63, 0.0  ;;  %v2956_v63 = vsub.f32 %v2790_v14, %v1468_v52  ;;  %v2961_v6 = vpop.permute.xlu2 %1277  ;;  %v353_v52 = vadd.f32 1e-05, %v337_v39 }
 0x208   : > { %4240 = vst [vmem:[#allocation54_spill] sm:$0xff] %v2961_v6 }
 0x209   : > { %4239 = vst [vmem:[#allocation53_spill] sm:$0xff] %v2956_v63  ;;  %v1500_v28 = vmul.f32 %v2956_v63, %v2956_v63  ;;  %v340_v63 = vmul.f32 0.020408163, %v2679_v25  ;;  %vm438_vm4 = vweird.f32 %v353_v52 }
 0x20d   : > { %1518 = vadd.xlane.f32.xlu1 %v1517_v20  ;;  %v348_v20 = vadd.f32 1e-05, %v332_v18  ;;  %v2963_v30 = vpop.permute.xlu1 %1282  ;;  %v1544_v18 = vsel %vm185_vm0, %v1500_v28, 0.0 }
 0x20e   : > { %4241 = vst [vmem:[#allocation55_spill] sm:$0xff] %v2963_v30  ;;  %v2972_v30 = vadd.f32 1e-05, %v340_v63 }
 0x20f   : > { %2200 = vrsqrt.f32 %v348_v20  ;;  %v2967_v34 = vpop.permute.xlu2 %1287  ;;  %vm388_vm14 = vweird.f32 %v348_v20 }
 0x210   : > { %4242 = vst [vmem:[#allocation56_spill] sm:$0xff] %v2967_v34  ;;  %vm468_vm7 = vweird.f32 %v2972_v30 }
 0x215   : > { %1527 = vadd.xlane.f32.xlu1 %v1526_v16  ;;  %v351_v16 = vadd.f32 1e-05, %v335_v54  ;;  %v2201_v3 = vpop.eup %2200  ;;  %v2970_v6 = vpop.permute.xlu1 %1297 }
 0x216   : > { %v383_v14 = vmul.f32 %v2201_v3, %v348_v20  ;;  %4243 = vst [vmem:[#allocation57_spill] sm:$0xff] %v2970_v6  ;;  %vm389_vm13 = vweird.f32 %v2201_v3 }
 0x217   : > { %2202 = vrsqrt.f32 %v351_v16  ;;  %v2974_v57 = vpop.permute.xlu2 %1302  ;;  %vm390_vm15 = vmor %vm388_vm14, %vm389_vm13  ;;  %vm418_vm1 = vweird.f32 %v351_v16 }
 0x218   : > { %v384_v23 = vmul.f32 %v2201_v3, %v383_v14  ;;  %2204 = vrsqrt.f32 %v353_v52 }
 0x219   : > { %2206 = vrsqrt.f32 %v2972_v30 }
 0x21a   : > { %v385_v54 = vmul.f32 0.5, %v384_v23 }
 0x21c   : > { %v386_v28 = vsub.f32 1.5, %v385_v54 }
 0x21d   : > { %1536 = vadd.xlane.f32.xlu1 %v1535_v58  ;;  %v2203_v58 = vpop.eup %2202  ;;  %v2978_v25 = vpop.permute.xlu1 %1312 }
 0x21e   : > { %v413_v45 = vmul.f32 %v2203_v58, %v351_v16  ;;  %v2205_v9 = vpop.eup %2204  ;;  %v387_v34 = vmul.f32 %v2201_v3, %v386_v28  ;;  %4244 = vst [vmem:[#allocation58_spill] sm:$0xff] %v2978_v25  ;;  %vm419_vm2 = vweird.f32 %v2203_v58 }
 0x21f   : > { %v433_v14 = vmul.f32 %v2205_v9, %v353_v52  ;;  %v2982_v6 = vpop.eup %2206  ;;  %v2989_v25 = vpop.permute.xlu2 %1317  ;;  %vm420_vm3 = vmor %vm418_vm1, %vm419_vm2  ;;  %vm439_vm5 = vweird.f32 %v2205_v9 }
 0x220   : > { %v414_v22 = vmul.f32 %v2203_v58, %v413_v45  ;;  %v391_v45 = vsel %vm390_vm15, %v2201_v3, %v387_v34  ;;  %v463_v20 = vmul.f32 %v2982_v6, %v2972_v30  ;;  %vm440_vm6 = vmor %vm438_vm4, %vm439_vm5  ;;  %vm469_vm8 = vweird.f32 %v2982_v6 }
 0x221   : > { %v434_v54 = vmul.f32 %v2205_v9, %v433_v14  ;;  %vm3023_vm9 = vmor %vm468_vm7, %vm469_vm8 }
 0x222   : > { %v415_v39 = vmul.f32 0.5, %v414_v22  ;;  %v941_v22 = vmul.f32 0.020408163, %v2809_v17  ;;  %v943_v17 = vmul.f32 0.020408163, %v2814_v40 }
 0x223   : > { %v435_v28 = vmul.f32 0.5, %v434_v54 }
 0x224   : > { %v416_v63 = vsub.f32 1.5, %v415_v39  ;;  %v2991_v3 = vadd.f32 1e-05, %v941_v22  ;;  %v464_v39 = vmul.f32 %v2982_v6, %v463_v20 }
 0x225   : > { %1545 = vadd.xlane.f32.xlu1 %v1544_v18  ;;  %v343_v18 = vmul.f32 0.020408163, %v2693_v44  ;;  %v540_v44 = vmul.f32 %v2736_v37, %v391_v45  ;;  %v2993_v34 = vpop.permute.xlu1 %1327  ;;  %v436_v16 = vsub.f32 1.5, %v435_v28 }
 0x226   : > { %v465_v54 = vmul.f32 0.5, %v464_v39  ;;  %vm997_vm13 = vweird.f32 %v2991_v3 }
 0x227   : > { %v2980_v23 = vadd.f32 1e-05, %v343_v18  ;;  %v417_v18 = vmul.f32 %v2203_v58, %v416_v63  ;;  %v3003_v22 = vpop.permute.xlu2 %1332 }
 0x228   : > { %v466_v52 = vsub.f32 1.5, %v465_v54 }
 0x229   : > { %2208 = vrsqrt.f32 %v2980_v23  ;;  %v421_v14 = vsel %vm420_vm3, %v2203_v58, %v417_v18  ;;  %v3005_v58 = vadd.f32 1e-05, %v943_v17  ;;  %vm498_vm10 = vweird.f32 %v2980_v23 }
 0x22a   : > { %v543_v63 = vmul.f32 %v2745_v62, %v421_v14  ;;  %2210 = vrsqrt.f32 %v2991_v3  ;;  %v945_v14 = vmul.f32 0.020408163, %v2824_v31 }
 0x22b   : > { %2212 = vrsqrt.f32 %v3005_v58  ;;  %vm1017_vm1 = vweird.f32 %v3005_v58 }
 0x22f   : > { %v2996_v37 = vpop.eup %2208 }
 0x230   : > { %v493_v45 = vmul.f32 %v2996_v37, %v2980_v23  ;;  %v3008_v62 = vpop.eup %2210  ;;  %vm499_vm11 = vweird.f32 %v2996_v37 }
 0x231   : > { %vm3054_vm12 = vmor %vm498_vm10, %vm499_vm11  ;;  %vm998_vm14 = vweird.f32 %v3008_v62 }
 0x232   : > { %v494_v20 = vmul.f32 %v2996_v37, %v493_v45  ;;  %vm3087_vm15 = vmor %vm997_vm13, %vm998_vm14 }
 0x234   : > { %v495_v17 = vmul.f32 0.5, %v494_v20 }
 0x23e   : > { %566 = vperm.xlu1 %2187, %v540_v44   ;;  %v437_v44 = vmul.f32 %v2205_v9, %v436_v16 }
 0x240   : > { %v441_v40 = vsel %vm440_vm6, %v2205_v9, %v437_v44  ;;  %v992_v9 = vmul.f32 %v3008_v62, %v2991_v3 }
 0x241   : > { %v545_v39 = vmul.f32 %v2754_v21, %v441_v40  ;;  %v3028_v21 = vadd.f32 1e-05, %v945_v14 }
 0x242   : > { %v993_v20 = vmul.f32 %v3008_v62, %v992_v9  ;;  %v948_v9 = vmul.f32 0.020408163, %v2826_v7 }
 0x243   : > { %2214 = vrsqrt.f32 %v3028_v21  ;;  %vm1037_vm4 = vweird.f32 %v3028_v21 }
 0x246   : > { %581 = vperm.xlu1 %2187, %v543_v63   ;;  %v467_v63 = vmul.f32 %v2982_v6, %v466_v52 }
 0x248   : > { %v1408_v28 = vpop.xlane.xlu1 %1407  ;;  %v471_v52 = vsel %vm3023_vm9, %v2982_v6, %v467_v63  ;;  %v994_v63 = vmul.f32 0.5, %v993_v20 }
 0x249   : > { %v1454_v18 = vmul.f32 0.020408163, %v1408_v28  ;;  %v496_v28 = vsub.f32 1.5, %v495_v17  ;;  %v548_v17 = vmul.f32 %v2764_v8, %v471_v52 }
 0x24b   : > { %v3013_v16 = vsub.f32 %v2838_v55, %v1454_v18  ;;  %v3034_v18 = vpop.eup %2212  ;;  %v497_v23 = vmul.f32 %v2996_v37, %v496_v28  ;;  %v995_v28 = vsub.f32 1.5, %v994_v63 }
 0x24c   : > { %vm1018_vm2 = vweird.f32 %v3034_v18 }
 0x24d   : > { %v1486_v30 = vmul.f32 %v3013_v16, %v3013_v16  ;;  %v501_v20 = vsel %vm3054_vm12, %v2996_v37, %v497_v23  ;;  %v996_v3 = vmul.f32 %v3008_v62, %v995_v28  ;;  %vm3124_vm3 = vmor %vm1017_vm1, %vm1018_vm2 }
 0x24e   : > { %591 = vperm.xlu1 %2187, %v545_v39  }
 0x24f   : > { %v1411_v55 = vpop.xlane.xlu2 %1410  ;;  %v1502_v45 = vsel %vm185_vm0, %v1486_v30, 0.0 }
 0x250   : > { %v1455_v31 = vmul.f32 0.020408163, %v1411_v55  ;;  %1503 = vadd.xlane.f32.xlu2 %v1502_v45  ;;  %v1417_v44 = vpop.xlane.xlu1 %1416  ;;  %v3060_v55 = vadd.f32 1e-05, %v948_v9 }
 0x251   : > { %v1457_v40 = vmul.f32 0.020408163, %v1417_v44 }
 0x252   : > { %v3037_v39 = vsub.f32 %v2851_v36, %v1455_v31  ;;  %v1012_v36 = vmul.f32 %v3034_v18, %v3005_v58  ;;  %2216 = vrsqrt.f32 %v3060_v55  ;;  %vm1067_vm7 = vweird.f32 %v3060_v55 }
 0x253   : > { %v3042_v14 = vsub.f32 %v2854_v12, %v1457_v40  ;;  %v3066_v40 = vpop.eup %2214 }
 0x254   : > { %v1487_v6 = vmul.f32 %v3037_v39, %v3037_v39  ;;  %v1013_v44 = vmul.f32 %v3034_v18, %v1012_v36  ;;  %v951_v36 = vmul.f32 0.020408163, %v2830_v13  ;;  %vm1038_vm5 = vweird.f32 %v3066_v40 }
 0x255   : > { %v1489_v30 = vmul.f32 %v3042_v14, %v3042_v14  ;;  %vm3165_vm6 = vmor %vm1037_vm4, %vm1038_vm5 }
 0x256   : > { %v1505_v8 = vsel %vm185_vm0, %v1487_v6, 0.0  ;;  %606 = vperm.xlu1 %2187, %v548_v17   ;;  %v551_v6 = vmul.f32 %v2774_v0, %v501_v20  ;;  %v1014_v63 = vmul.f32 0.5, %v1013_v44  ;;  %v1000_v44 = vsel %vm3087_vm15, %v3008_v62, %v996_v3 }
 0x257   : > { %v1420_v7 = vpop.xlane.xlu2 %1419  ;;  %1506 = vadd.xlane.f32.xlu0 %v1505_v8  ;;  %v1511_v54 = vsel %vm185_vm0, %v1489_v30, 0.0  ;;  %v331_v30 = vmul.f32 0.020408163, %v2649_v43  ;;  %v954_v62 = vmul.f32 0.020408163, %v2842_v33 }
 0x258   : > { %v1458_v45 = vmul.f32 0.020408163, %v1420_v7  ;;  %1512 = vadd.xlane.f32.xlu2 %v1511_v54  ;;  %v1426_v31 = vpop.xlane.xlu1 %1425  ;;  %v3094_v7 = vadd.f32 1e-05, %v951_v36  ;;  %v3100_v20 = vpop.eup %2216 }
 0x259   : > { %v1460_v52 = vmul.f32 0.020408163, %v1426_v31  ;;  %v1015_v31 = vsub.f32 1.5, %v1014_v63  ;;  %v1062_v58 = vmul.f32 %v3100_v20, %v3060_v55  ;;  %v3133_v0 = vadd.f32 1e-05, %v954_v62 }
 0x25a   : > { %v3069_v17 = vsub.f32 %v2865_v4, %v1458_v45  ;;  %v1032_v4 = vmul.f32 %v3066_v40, %v3028_v21  ;;  %2218 = vrsqrt.f32 %v3094_v7  ;;  %vm1068_vm8 = vweird.f32 %v3100_v20 }
 0x25b   : > { %v3074_v9 = vsub.f32 %v2868_v11, %v1460_v52  ;;  %v330_v11 = vmul.f32 0.020408163, %v2639_v29  ;;  %vm3208_vm9 = vmor %vm1067_vm7, %vm1068_vm8  ;;  %vm1097_vm10 = vweird.f32 %v3094_v7  ;;  %vm1127_vm14 = vweird.f32 %v3133_v0 }
 0x25c   : > { %v1490_v37 = vmul.f32 %v3069_v17, %v3069_v17  ;;  %v1033_v29 = vmul.f32 %v3066_v40, %v1032_v4  ;;  %v1016_v4 = vmul.f32 %v3034_v18, %v1015_v31 }
 0x25d   : > { %v1492_v23 = vmul.f32 %v3074_v9, %v3074_v9  ;;  %v3102_v43 = vadd.f32 1e-05, %v330_v11  ;;  %v338_v11 = vmul.f32 0.020408163, %v2645_v41  ;;  %v333_v41 = vmul.f32 0.020408163, %v2643_v35 }
 0x25e   : > { %v1514_v13 = vsel %vm185_vm0, %v1490_v37, 0.0  ;;  %621 = vperm.xlu1 %2187, %v551_v6   ;;  %v3107_v6 = vadd.f32 1e-05, %v331_v30  ;;  %v1150_v37 = vmul.f32 %v2785_v10, %v1000_v44 }
 0x25f   : > { %v1429_v12 = vpop.xlane.xlu2 %1428  ;;  %1515 = vadd.xlane.f32.xlu0 %v1514_v13  ;;  %v1520_v8 = vsel %vm185_vm0, %v1492_v23, 0.0  ;;  %2220 = vrsqrt.f32 %v3102_v43 }
 0x260   : > { %v1461_v54 = vmul.f32 0.020408163, %v1429_v12  ;;  %1521 = vadd.xlane.f32.xlu2 %v1520_v8  ;;  %v1435_v45 = vpop.xlane.xlu1 %1434  ;;  %2222 = vrsqrt.f32 %v3107_v6  ;;  %v1020_v8 = vsel %vm3124_vm3, %v3034_v18, %v1016_v4  ;;  %v3139_v31 = vpop.eup %2218  ;;  %vm378_vm1 = vweird.f32 %v3107_v6 }
 0x261   : > { %v1463_v28 = vmul.f32 0.020408163, %v1435_v45  ;;  %v1152_v18 = vmul.f32 %v2793_v5, %v1020_v8  ;;  %2224 = vrsqrt.f32 %v3133_v0  ;;  %v1092_v21 = vmul.f32 %v3139_v31, %v3094_v7 }
 0x262   : > { %v3105_v52 = vsub.f32 %v2881_v32, %v1461_v54  ;;  %v1034_v32 = vmul.f32 0.5, %v1033_v29  ;;  %v1063_v54 = vmul.f32 %v3100_v20, %v1062_v58  ;;  %vm1098_vm11 = vweird.f32 %v3139_v31 }
 0x263   : > { %v3112_v36 = vsub.f32 %v2884_v27, %v1463_v28  ;;  %v3150_v28 = vadd.f32 1e-05, %v338_v11  ;;  %v341_v27 = vmul.f32 0.020408163, %v2651_v46  ;;  %v1093_v11 = vmul.f32 %v3139_v31, %v1092_v21  ;;  %vm3238_vm12 = vmor %vm1097_vm10, %vm1098_vm11 }
 0x264   : > { %v1493_v63 = vmul.f32 %v3105_v52, %v3105_v52  ;;  %v1035_v12 = vsub.f32 1.5, %v1034_v32  ;;  %v1064_v62 = vmul.f32 0.5, %v1063_v54  ;;  %vm368_vm3 = vweird.f32 %v3102_v43 }
 0x265   : > { %v1495_v3 = vmul.f32 %v3112_v36, %v3112_v36  ;;  %2226 = vrsqrt.f32 %v3150_v28 }
 0x266   : > { %v1523_v10 = vsel %vm185_vm0, %v1493_v63, 0.0  ;;  %1176 = vperm.xlu1 %2187, %v1150_v37   ;;  %v1036_v35 = vmul.f32 %v3066_v40, %v1035_v12  ;;  %v2098_v12 = vld [vmem:[%s2726_s18 + $0xb0] sm:$0xff] }
 0x267   : > { %v1438_v33 = vpop.xlane.xlu2 %1437  ;;  %1524 = vadd.xlane.f32.xlu0 %v1523_v10  ;;  %v1529_v23 = vsel %vm185_vm0, %v1495_v3, 0.0  ;;  %v3171_v3 = vadd.f32 1e-05, %v333_v41  ;;  %v334_v41 = vmul.f32 0.020408163, %v2655_v49 }
 0x268   : > { %v1464_v13 = vmul.f32 0.020408163, %v1438_v33  ;;  %1530 = vadd.xlane.f32.xlu2 %v1529_v23  ;;  %v1444_v30 = vpop.xlane.xlu1 %1443  ;;  %v1065_v23 = vsub.f32 1.5, %v1064_v62  ;;  %v1094_v62 = vmul.f32 0.5, %v1093_v11  ;;  %v2101_v11 = vld [vmem:[%s2726_s18 + $0xc8] sm:$0xff] }
 0x269   : > { %v1466_v45 = vmul.f32 0.020408163, %v1444_v30  ;;  %v1040_v30 = vsel %vm3165_vm6, %v3066_v40, %v1036_v35  ;;  %2228 = vrsqrt.f32 %v3171_v3  ;;  %vm448_vm6 = vweird.f32 %v3150_v28 }
 0x26a   : > { %v3142_v29 = vsub.f32 %v2893_v59, %v1464_v13  ;;  %v3156_v59 = vpop.eup %2220  ;;  %v1154_v35 = vmul.f32 %v2098_v12, %v1040_v30  ;;  %vm398_vm10 = vweird.f32 %v3171_v3 }
 0x26b   : > { %v3148_v44 = vsub.f32 %v2896_v2, %v1466_v45  ;;  %v3163_v63 = vpop.eup %2222  ;;  %v363_v54 = vmul.f32 %v3156_v59, %v3102_v43  ;;  %vm369_vm5 = vweird.f32 %v3156_v59 }
 0x26c   : > { %v1496_v37 = vmul.f32 %v3142_v29, %v3142_v29  ;;  %v3180_v8 = vpop.eup %2224  ;;  %v373_v46 = vmul.f32 %v3163_v63, %v3107_v6  ;;  %vm379_vm13 = vweird.f32 %v3163_v63  ;;  %vm370_vm8 = vmor %vm368_vm3, %vm369_vm5 }
 0x26d   : > { %v1498_v2 = vmul.f32 %v3148_v44, %v3148_v44  ;;  %v1122_v49 = vmul.f32 %v3180_v8, %v3133_v0  ;;  %vm1128_vm15 = vweird.f32 %v3180_v8  ;;  %vm3273_vm2 = vmor %vm378_vm1, %vm379_vm13 }
 0x26e   : > { %v1532_v32 = vsel %vm185_vm0, %v1496_v37, 0.0  ;;  %1186 = vperm.xlu1 %2187, %v1152_v18   ;;  %v3196_v18 = vadd.f32 1e-05, %v341_v27  ;;  %v374_v21 = vmul.f32 %v3163_v63, %v373_v46  ;;  %v364_v27 = vmul.f32 %v3156_v59, %v363_v54  ;;  %vm3279_vm4 = vmor %vm1127_vm14, %vm1128_vm15 }
 0x26f   : > { %v1447_v4 = vpop.xlane.xlu2 %1446  ;;  %1533 = vadd.xlane.f32.xlu0 %v1532_v32  ;;  %v1538_v58 = vsel %vm185_vm0, %v1498_v2, 0.0  ;;  %v3213_v32 = vadd.f32 1e-05, %v334_v41 }
 0x270   : > { %v1467_v10 = vmul.f32 0.020408163, %v1447_v4  ;;  %1539 = vadd.xlane.f32.xlu2 %v1538_v58  ;;  %v1453_v33 = vpop.xlane.xlu1 %1452  ;;  %v344_v4 = vmul.f32 0.020408163, %v2657_v53  ;;  %2230 = vrsqrt.f32 %v3196_v18  ;;  %v375_v30 = vmul.f32 0.5, %v374_v21 }
 0x271   : > { %v1469_v13 = vmul.f32 0.020408163, %v1453_v33  ;;  %v1123_v33 = vmul.f32 %v3180_v8, %v1122_v49  ;;  %v336_v53 = vmul.f32 0.020408163, %v2647_v42  ;;  %2232 = vrsqrt.f32 %v3213_v32 }
 0x272   : > { %v3187_v45 = vsub.f32 %v2905_v56, %v1467_v10  ;;  %v1066_v56 = vmul.f32 %v3100_v20, %v1065_v23  ;;  %v1095_v10 = vsub.f32 1.5, %v1094_v62  ;;  %v3230_v54 = vadd.f32 1e-05, %v344_v4 }
 0x273   : > { %v3193_v40 = vsub.f32 %v2910_v50, %v1469_v13  ;;  %v3205_v50 = vpop.eup %2226  ;;  %v365_v46 = vmul.f32 0.5, %v364_v27  ;;  %v1124_v42 = vmul.f32 0.5, %v1123_v33  ;;  %v940_v4 = vmul.f32 0.020408163, %v2803_v26 }
 0x274   : > { %v1499_v37 = vmul.f32 %v3187_v45, %v3187_v45  ;;  %v1070_v23 = vsel %vm3208_vm9, %v3100_v20, %v1066_v56  ;;  %v3224_v13 = vpop.eup %2228  ;;  %v443_v12 = vmul.f32 %v3205_v50, %v3150_v28  ;;  %2234 = vrsqrt.f32 %v3230_v54 }
 0x275   : > { %v1501_v55 = vmul.f32 %v3193_v40, %v3193_v40  ;;  %v1157_v41 = vmul.f32 %v2101_v11, %v1070_v23  ;;  %v393_v20 = vmul.f32 %v3224_v13, %v3171_v3  ;;  %v366_v21 = vsub.f32 1.5, %v365_v46 }
 0x276   : > { %v1541_v5 = vsel %vm185_vm0, %v1499_v37, 0.0  ;;  %1196 = vperm.xlu1 %2187, %v1154_v35   ;;  %v1096_v37 = vmul.f32 %v3139_v31, %v1095_v10  ;;  %v376_v35 = vsub.f32 1.5, %v375_v30  ;;  %v444_v56 = vmul.f32 %v3205_v50, %v443_v12  ;;  %v3244_v49 = vpop.eup %2230  ;;  %v2104_v10 = vld [vmem:[%s2726_s18 + $0xe0] sm:$0xff] }
 0x277   : > { %1542 = vadd.xlane.f32.xlu0 %v1541_v5  ;;  %v1547_v58 = vsel %vm185_vm0, %v1501_v55, 0.0  ;;  %v3246_v55 = vadd.f32 1e-05, %v336_v53  ;;  %v3249_v2 = vpop.eup %2232  ;;  %v394_v5 = vmul.f32 %v3224_v13, %v393_v20  ;;  %v473_v23 = vmul.f32 %v3244_v49, %v3196_v18 }
 0x278   : > { %1548 = vadd.xlane.f32.xlu2 %v1547_v58  ;;  %v3242_v7 = vpop.xlane.xlu1 %1509  ;;  %v1125_v58 = vsub.f32 1.5, %v1124_v42  ;;  %v1100_v27 = vsel %vm3238_vm12, %v3139_v31, %v1096_v37  ;;  %v445_v33 = vmul.f32 0.5, %v444_v56  ;;  %v377_v11 = vmul.f32 %v3163_v63, %v376_v35  ;;  %v523_v37 = vld [vmem:[%s2726_s18 + $0x8] sm:$0xff] }
 0x279   : > { %2236 = vrsqrt.f32 %v3246_v55  ;;  %v339_v30 = vmul.f32 0.020408163, %v2653_v48  ;;  %v403_v26 = vmul.f32 %v3249_v2, %v3213_v32  ;;  %v1160_v31 = vmul.f32 %v2104_v10, %v1100_v27  ;;  %v2107_v10 = vld [vmem:[%s2726_s18 + $0xf8] sm:$0xff] }
 0x27a   : > { %v3268_v53 = vpop.eup %2234  ;;  %v3270_v12 = vadd.f32 1e-05, %v940_v4  ;;  %v1126_v46 = vmul.f32 %v3180_v8, %v1125_v58  ;;  %v446_v48 = vsub.f32 1.5, %v445_v33  ;;  %v474_v0 = vmul.f32 %v3244_v49, %v473_v23 }
 0x27b   : > { %v381_v20 = vsel %vm3273_vm2, %v3163_v63, %v377_v11  ;;  %v395_v42 = vmul.f32 0.5, %v394_v5  ;;  %v3287_v35 = vadd.f32 1e-05, %v339_v30  ;;  %v367_v56 = vmul.f32 %v3156_v59, %v366_v21 }
 0x27c   : > { %v404_v62 = vmul.f32 %v3249_v2, %v403_v26  ;;  %v503_v4 = vmul.f32 %v3268_v53, %v3230_v54  ;;  %vm449_vm7 = vweird.f32 %v3205_v50  ;;  %2238 = vrsqrt.f32 %v3270_v12 }
 0x27d   : > { %v947_v5 = vmul.f32 0.020408163, %v2832_v1  ;;  %v539_v21 = vmul.f32 %v523_v37, %v381_v20  ;;  %v1130_v27 = vsel %vm3279_vm4, %v3180_v8, %v1126_v46  ;;  %v475_v33 = vmul.f32 0.5, %v474_v0  ;;  %vm3313_vm9 = vmor %vm448_vm6, %vm449_vm7 }
 0x27e   : > { %1211 = vperm.xlu1 %2187, %v1157_v41   ;;  %v447_v23 = vmul.f32 %v3205_v50, %v446_v48  ;;  %v396_v11 = vsub.f32 1.5, %v395_v42  ;;  %2240 = vrsqrt.f32 %v3287_v35  ;;  %v371_v30 = vsel %vm370_vm8, %v3156_v59, %v367_v56  ;;  %v2288_v59 = vld [vmem:[%s2726_s18] sm:$0xff] }
 0x27f   : > { %v3298_v63 = vpop.eup %2236  ;;  %v405_v8 = vmul.f32 0.5, %v404_v62  ;;  %v1163_v43 = vmul.f32 %v2107_v10, %v1130_v27  ;;  %v3320_v46 = vadd.f32 1e-05, %v947_v5  ;;  %v476_v41 = vsub.f32 1.5, %v475_v33  ;;  %v2289_v56 = vld [vmem:[%s2726_s18 + $0x40] sm:$0xff] }
 0x280   : > { %v3296_v58 = vpop.xlane.xlu1 %1518  ;;  %v423_v26 = vmul.f32 %v3298_v63, %v3246_v55  ;;  %v342_v48 = vmul.f32 0.020408163, %v2659_v38  ;;  %v538_v28 = vmul.f32 %v2288_v59, %v371_v30  ;;  %v451_v0 = vsel %vm3313_vm9, %v3205_v50, %v447_v23 }
 0x281   : > { %v397_v20 = vmul.f32 %v3224_v13, %v396_v11  ;;  %vm399_vm11 = vweird.f32 %v3224_v13  ;;  %v406_v37 = vsub.f32 1.5, %v405_v8  ;;  %vm478_vm12 = vweird.f32 %v3196_v18 }
 0x282   : > { %v3327_v6 = vpop.eup %2238  ;;  %v424_v42 = vmul.f32 %v3298_v63, %v423_v26  ;;  %vm479_vm13 = vweird.f32 %v3244_v49  ;;  %v546_v62 = vmul.f32 %v2289_v56, %v451_v0  ;;  %2242 = vrsqrt.f32 %v3320_v46  ;;  %vm3346_vm14 = vmor %vm398_vm10, %vm399_vm11  ;;  %v2290_v26 = vld [vmem:[%s2726_s18 + $0x18] sm:$0xff] }
 0x283   : > { %v3340_v5 = vadd.f32 1e-05, %v342_v48  ;;  %v477_v10 = vmul.f32 %v3244_v49, %v476_v41  ;;  %vm3358_vm15 = vmor %vm478_vm12, %vm479_vm13  ;;  %v345_v11 = vmul.f32 0.020408163, %v2666_v19  ;;  %v407_v30 = vmul.f32 %v3249_v2, %v406_v37 }
 0x284   : > { %v3335_v38 = vpop.eup %2240  ;;  %vm409_vm1 = vweird.f32 %v3249_v2  ;;  %vm408_vm2 = vweird.f32 %v3213_v32  ;;  %v425_v1 = vmul.f32 0.5, %v424_v42  ;;  %vm508_vm3 = vweird.f32 %v3230_v54 }
 0x285   : > { %v453_v3 = vmul.f32 %v3335_v38, %v3287_v35  ;;  %2244 = vrsqrt.f32 %v3340_v5  ;;  %v481_v19 = vsel %vm3358_vm15, %v3244_v49, %v477_v10  ;;  %vm3379_vm4 = vmor %vm408_vm2, %vm409_vm1  ;;  %vm509_vm5 = vweird.f32 %v3268_v53  ;;  %v2291_v49 = vld [vmem:[%s2726_s18 + $0x58] sm:$0xff] }
 0x286   : > { %1226 = vperm.xlu1 %2187, %v1160_v31   ;;  %v504_v31 = vmul.f32 %v3268_v53, %v503_v4  ;;  %v950_v4 = vmul.f32 0.020408163, %v2856_v60  ;;  %v401_v60 = vsel %vm3346_vm14, %v3224_v13, %v397_v20  ;;  %v3385_v48 = vadd.f32 1e-05, %v345_v11  ;;  %vm3394_vm6 = vmor %vm508_vm3, %vm509_vm5 }
 0x287   : > { %v454_v41 = vmul.f32 %v3335_v38, %v453_v3  ;;  %v411_v59 = vsel %vm3379_vm4, %v3249_v2, %v407_v30  ;;  %v953_v0 = vmul.f32 0.020408163, %v2872_v61  ;;  %v426_v20 = vsub.f32 1.5, %v425_v1  ;;  %v2293_v1 = vld [vmem:[%s2726_s18 + $0x70] sm:$0xff] }
 0x288   : > { %v505_v50 = vmul.f32 0.5, %v504_v31  ;;  %v3351_v33 = vpop.xlane.xlu1 %1527  ;;  %v3368_v18 = vadd.f32 1e-05, %v950_v4  ;;  %v3376_v31 = vpop.eup %2242  ;;  %v939_v61 = vmul.f32 0.020408163, %v2812_v15  ;;  %vm429_vm7 = vweird.f32 %v3298_v63 }
 0x289   : > { %v455_v56 = vmul.f32 0.5, %v454_v41  ;;  %v3410_v10 = vadd.f32 1e-05, %v953_v0  ;;  %v427_v3 = vmul.f32 %v3298_v63, %v426_v20  ;;  %vm428_vm8 = vweird.f32 %v3246_v55  ;;  %v3430_v55 = vld [vmem:[%s2726_s18 + $0x30] sm:$0xff] }
 0x28a   : > { %v506_v13 = vsub.f32 1.5, %v505_v50  ;;  %2246 = vrsqrt.f32 %v3368_v18  ;;  %v1052_v50 = vmul.f32 %v3376_v31, %v3320_v46  ;;  %vm987_vm9 = vweird.f32 %v3270_v12  ;;  %vm430_vm11 = vmor %vm428_vm8, %vm429_vm7 }
 0x28b   : > { %561 = vperm.xlu0 %2186, %v539_v21   ;;  %v982_v21 = vmul.f32 %v3327_v6, %v3270_v12  ;;  %v3400_v2 = vpop.eup %2244  ;;  %2248 = vrsqrt.f32 %v3385_v48  ;;  %vm988_vm10 = vweird.f32 %v3327_v6  ;;  %v456_v15 = vsub.f32 1.5, %v455_v56 }
 0x28c   : > { %v507_v54 = vmul.f32 %v3268_v53, %v506_v13  ;;  %v1053_v23 = vmul.f32 %v3376_v31, %v1052_v50  ;;  %v483_v30 = vmul.f32 %v3400_v2, %v3340_v5  ;;  %2250 = vrsqrt.f32 %v3410_v10  ;;  %vm3440_vm12 = vmor %vm987_vm9, %vm988_vm10 }
 0x28d   : > { %v983_v8 = vmul.f32 %v3327_v6, %v982_v21  ;;  %vm459_vm13 = vweird.f32 %v3335_v38  ;;  %vm458_vm14 = vweird.f32 %v3287_v35  ;;  %vm1057_vm15 = vweird.f32 %v3320_v46 }
 0x28e   : > { %1241 = vperm.xlu1 %2187, %v1163_v43   ;;  %v541_v43 = vmul.f32 %v2290_v26, %v401_v60  ;;  %v511_v27 = vsel %vm3394_vm6, %v3268_v53, %v507_v54  ;;  %v3422_v53 = vadd.f32 1e-05, %v939_v61  ;;  %v484_v41 = vmul.f32 %v3400_v2, %v483_v30  ;;  %vm460_vm2 = vmor %vm458_vm14, %vm459_vm13  ;;  %v3472_v61 = vld [vmem:[%s2726_s18 + $0x48] sm:$0xff] }
 0x28f   : > { %v984_v37 = vmul.f32 0.5, %v983_v8  ;;  %v552_v13 = vmul.f32 %v2293_v1, %v511_v27  ;;  %v1054_v8 = vmul.f32 0.5, %v1053_v23  ;;  %vm1058_vm1 = vweird.f32 %v3376_v31 }
 0x290   : > { %556 = vperm.xlu2 %2188, %v538_v28   ;;  %v549_v28 = vmul.f32 %v2291_v49, %v481_v19  ;;  %v3403_v21 = vpop.xlane.xlu1 %1536  ;;  %v3415_v11 = vpop.eup %2246  ;;  %2252 = vrsqrt.f32 %v3422_v53  ;;  %v457_v49 = vmul.f32 %v3335_v38, %v456_v15  ;;  %v485_v50 = vmul.f32 0.5, %v484_v41  ;;  %vm3478_vm3 = vmor %vm1057_vm15, %vm1058_vm1 }
 0x291   : > { %v985_v60 = vsub.f32 1.5, %v984_v37  ;;  %v1082_v26 = vmul.f32 %v3415_v11, %v3368_v18  ;;  %v3433_v32 = vpop.eup %2248  ;;  %v1055_v54 = vsub.f32 1.5, %v1054_v8  ;;  %v3456_v37 = vld [vmem:[%s2726_s18 + $0x88] sm:$0xff]  ;;  %vm489_vm4 = vweird.f32 %v3400_v2 }
 0x292   : > { %v3458_v42 = vpop.eup %2250  ;;  %v486_v46 = vsub.f32 1.5, %v485_v50  ;;  %vm1087_vm5 = vweird.f32 %v3368_v18  ;;  %vm1088_vm6 = vweird.f32 %v3415_v11  ;;  %vm488_vm7 = vweird.f32 %v3340_v5 }
 0x293   : > { %596 = vperm.xlu0 %2186, %v546_v62   ;;  %v2292_v62 = vld [vmem:[%s2726_s18 + $0x20] sm:$0xff]  ;;  %v986_v19 = vmul.f32 %v3327_v6, %v985_v60  ;;  %v1083_v0 = vmul.f32 %v3415_v11, %v1082_v26  ;;  %v1112_v35 = vmul.f32 %v3458_v42, %v3410_v10  ;;  %v1056_v27 = vmul.f32 %v3376_v31, %v1055_v54  ;;  %vm490_vm8 = vmor %vm488_vm7, %vm489_vm4 }
 0x294   : > { %v542_v4 = vmul.f32 %v2292_v62, %v411_v59  ;;  %v487_v26 = vmul.f32 %v3400_v2, %v486_v46  ;;  %vm3499_vm9 = vmor %vm1087_vm5, %vm1088_vm6  ;;  %v4279_v54 = vld [vmem:[#allocation38_spill] sm:$0xff]  ;;  %vm519_vm10 = vweird.f32 %v3433_v32  ;;  %vm518_vm13 = vweird.f32 %v3385_v48 }
 0x295   : > { %v990_v12 = vsel %vm3440_vm12, %v3327_v6, %v986_v19  ;;  %v461_v6 = vsel %vm460_vm2, %v3335_v38, %v457_v49  ;;  %v1113_v15 = vmul.f32 %v3458_v42, %v1112_v35  ;;  %v1060_v1 = vsel %vm3478_vm3, %v3376_v31, %v1056_v27  ;;  %v2294_v19 = vld [vmem:[%s2726_s18 + $0xc0] sm:$0xff]  ;;  %vm520_vm14 = vmor %vm518_vm13, %vm519_vm10 }
 0x296   : > { %v1149_v56 = vmul.f32 %v3456_v37, %v990_v12  ;;  %v3475_v60 = vpop.eup %2252  ;;  %v547_v38 = vmul.f32 %v3472_v61, %v461_v6  ;;  %v1156_v41 = vmul.f32 %v2294_v19, %v1060_v1  ;;  %v491_v5 = vsel %vm490_vm8, %v3400_v2, %v487_v26  ;;  %v3506_v12 = vld [vmem:[%s2726_s18 + $0x60] sm:$0xff]  ;;  %v4283_v1 = vld [vmem:[#allocation41_spill] sm:$0xff] }
 0x297   : > { %v972_v8 = vmul.f32 %v3475_v60, %v3422_v53  ;;  %v1114_v59 = vmul.f32 0.5, %v1113_v15  ;;  %vm1118_vm12 = vweird.f32 %v3458_v42  ;;  %vm977_vm1 = vweird.f32 %v3422_v53 }
 0x298   : > { %571 = vperm.xlu2 %2188, %v541_v43   ;;  %v431_v43 = vsel %vm430_vm11, %v3298_v63, %v427_v3  ;;  %v3450_v20 = vpop.xlane.xlu1 %1545  ;;  %vm1117_vm11 = vweird.f32 %v3410_v10  ;;  %vm978_vm2 = vweird.f32 %v3475_v60 }
 0x299   : > { %v544_v63 = vmul.f32 %v3430_v55, %v431_v43  ;;  %vm3533_vm15 = vmor %vm1117_vm11, %vm1118_vm12 }
 0x29a   : > { %vm3551_vm3 = vmor %vm977_vm1, %vm978_vm2 }
 0x29b   : > { %611 = vperm.xlu0 %2186, %v549_v28   ;;  %v942_v28 = vmul.f32 0.020408163, %v2821_v47  ;;  %v513_v47 = vmul.f32 %v3433_v32, %v3385_v48 }
 0x29d   : > { %v3467_v62 = vadd.f32 1e-05, %v942_v28  ;;  %v514_v23 = vmul.f32 %v3433_v32, %v513_v47  ;;  %v973_v28 = vmul.f32 %v3475_v60, %v972_v8  ;;  %v1115_v47 = vsub.f32 1.5, %v1114_v59  ;;  %v3540_v8 = vld [vmem:[%s2726_s18 + $0x78] sm:$0xff] }
 0x29e   : > { %v4286_v59 = vld [vmem:[#allocation9_spill] sm:$0xff] }
 0x29f   : > { %2254 = vrsqrt.f32 %v3467_v62  ;;  %vm1007_vm4 = vweird.f32 %v3467_v62 }
 0x2a0   : > { %576 = vperm.xlu2 %2188, %v542_v4   ;;  %v1084_v4 = vmul.f32 0.5, %v1083_v0 }
 0x2a2   : > { %v1085_v30 = vsub.f32 1.5, %v1084_v4  ;;  %v974_v4 = vmul.f32 0.5, %v973_v28 }
 0x2a3   : > { %626 = vperm.xlu0 %2186, %v552_v13   ;;  %v515_v13 = vmul.f32 0.5, %v514_v23  ;;  %v2295_v23 = vld [vmem:[%s2726_s18 + $0xd8] sm:$0xff] }
 0x2a5   : > { %v516_v49 = vsub.f32 1.5, %v515_v13 }
 0x2a7   : > { %v517_v2 = vmul.f32 %v3433_v32, %v516_v49  ;;  %v2296_v49 = vld [vmem:[%s2726_s18 + $0xf0] sm:$0xff] }
 0x2a8   : > { %586 = vperm.xlu2 %2188, %v544_v63   ;;  %v1086_v63 = vmul.f32 %v3415_v11, %v1085_v30  ;;  %v975_v30 = vsub.f32 1.5, %v974_v4  ;;  %v1555_v4 = vmul.f32 0.020408163, %v3296_v58 }
 0x2a9   : > { %v521_v48 = vsel %vm520_vm14, %v3433_v32, %v517_v2  ;;  %v4291_v32 = vld [vmem:[#allocation15_spill] sm:$0xff] }
 0x2aa   : > { %v1090_v6 = vsel %vm3499_vm9, %v3415_v11, %v1086_v63  ;;  %v4280_v11 = vld [vmem:[#allocation3_spill] sm:$0xff] }
 0x2ab   : > { %1171 = vperm.xlu0 %2186, %v1149_v56   ;;  %v550_v56 = vmul.f32 %v3506_v12, %v491_v5  ;;  %v1159_v3 = vmul.f32 %v2295_v23, %v1090_v6  ;;  %v2297_v6 = vld [vmem:[%s2726_s18 + $0x80] sm:$0xff]  ;;  %v3576_v23 = vadd.f32 1e-05, %v1555_v4 }
 0x2ad   : > { %vm1638_vm1 = vweird.f32 %v3576_v23 }
 0x2b0   : > { %601 = vperm.xlu2 %2188, %v547_v38   ;;  %v567_v43 = vpop.permute.xlu1 %566  ;;  %v1116_v38 = vmul.f32 %v3458_v42, %v1115_v47  ;;  %v1552_v47 = vmul.f32 0.020408163, %v3242_v7  ;;  %v4290_v7 = vld [vmem:[#allocation12_spill] sm:$0xff] }
 0x2b1   : > { %v636_v31 = vmul.f32 %v567_v43, %v2461_v51  ;;  %v3508_v51 = vpop.eup %2254  ;;  %v553_v43 = vmul.f32 %v3540_v8, %v521_v48 }
 0x2b2   : > { %v1002_v35 = vmul.f32 %v3508_v51, %v3467_v62  ;;  %vm1008_vm5 = vweird.f32 %v3508_v51 }
 0x2b3   : > { %v732_v0 = vadd.f32 %v4279_v54, %v636_v31  ;;  %1206 = vperm.xlu0 %2186, %v1156_v41   ;;  %v1120_v31 = vsel %vm3533_vm15, %v3458_v42, %v1116_v38  ;;  %v976_v41 = vmul.f32 %v3475_v60, %v975_v30  ;;  %v4287_v54 = vld [vmem:[#allocation42_spill] sm:$0xff]  ;;  %vm3569_vm6 = vmor %vm1007_vm4, %vm1008_vm5 }
 0x2b4   : > { %v1003_v15 = vmul.f32 %v3508_v51, %v1002_v35  ;;  %v1162_v28 = vmul.f32 %v2296_v49, %v1120_v31 }
 0x2b5   : > { %v748_v50 = vmax.f32 %v732_v0, 0.0  ;;  %v980_v42 = vsel %vm3551_vm3, %v3475_v60, %v976_v41 }
 0x2b6   : > { %v1004_v19 = vmul.f32 0.5, %v1003_v15  ;;  %v1148_v2 = vmul.f32 %v2297_v6, %v980_v42 }
 0x2b7   : > { %764 = vst.msk [vmem:[%s3514_s21 + $0x10] sm:$0xff] %vm185_vm0, %v748_v50 }
 0x2b8   : > { %616 = vperm.xlu2 %2188, %v550_v56   ;;  %v582_v27 = vpop.permute.xlu1 %581  ;;  %v1005_v18 = vsub.f32 1.5, %v1004_v19 }
 0x2b9   : > { %v639_v46 = vmul.f32 %v582_v27, %v4280_v11  ;;  %v3573_v11 = vadd.f32 1e-05, %v1552_v47 }
 0x2ba   : > { %v1006_v27 = vmul.f32 %v3508_v51, %v1005_v18  ;;  %v4292_v18 = vld [vmem:[#allocation48_spill] sm:$0xff] }
 0x2bb   : > { %v735_v13 = vadd.f32 %v4283_v1, %v639_v46  ;;  %1221 = vperm.xlu0 %2186, %v1159_v3   ;;  %v1558_v1 = vmul.f32 0.020408163, %v3351_v33  ;;  %vm1608_vm3 = vweird.f32 %v3573_v11 }
 0x2bc   : > { %v1010_v3 = vsel %vm3569_vm6, %v3508_v51, %v1006_v27 }
 0x2bd   : > { %v751_v26 = vmax.f32 %v735_v13, 0.0  ;;  %v3594_v33 = vadd.f32 1e-05, %v1558_v1 }
 0x2bf   : > { %767 = vst.msk [vmem:[%s3514_s21 + $0x28] sm:$0xff] %vm185_vm0, %v751_v26  ;;  %vm1668_vm6 = vweird.f32 %v3594_v33 }
 0x2c0   : > { %631 = vperm.xlu2 %2188, %v553_v43   ;;  %v592_v53 = vpop.permute.xlu1 %591  ;;  %v2298_v43 = vld [vmem:[%s2726_s18 + $0x98] sm:$0xff] }
 0x2c1   : > { %v641_v63 = vmul.f32 %v592_v53, %v4286_v59  ;;  %v1151_v31 = vmul.f32 %v2298_v43, %v1010_v3  ;;  %v1561_v59 = vmul.f32 0.020408163, %v3403_v21 }
 0x2c3   : > { %v737_v0 = vadd.f32 %v4287_v54, %v641_v63  ;;  %1236 = vperm.xlu0 %2186, %v1162_v28   ;;  %v1504_v5 = vpop.xlane.xlu2 %1503 }
 0x2c4   : > { %v1550_v50 = vmul.f32 0.020408163, %v1504_v5 }
 0x2c5   : > { %v753_v56 = vmax.f32 %v737_v0, 0.0 }
 0x2c6   : > { %v1566_v35 = vadd.f32 1e-05, %v1550_v50 }
 0x2c7   : > { %769 = vst.msk [vmem:[%s3514_s21 + $0x38] sm:$0xff] %vm185_vm0, %v753_v56  ;;  %v3608_v56 = vadd.f32 1e-05, %v1561_v59 }
 0x2c8   : > { %2256 = vrsqrt.f32 %v1566_v35  ;;  %1166 = vperm.xlu2 %2188, %v1148_v2   ;;  %v607_v62 = vpop.permute.xlu1 %606  ;;  %vm1588_vm7 = vweird.f32 %v1566_v35 }
 0x2c9   : > { %v644_v46 = vmul.f32 %v607_v62, %v4290_v7  ;;  %2258 = vrsqrt.f32 %v3573_v11  ;;  %v4295_v62 = vld [vmem:[#allocation35_spill] sm:$0xff] }
 0x2ca   : > { %v1507_v58 = vpop.xlane.xlu0 %1506  ;;  %2260 = vrsqrt.f32 %v3576_v23 }
 0x2cb   : > { %v740_v38 = vadd.f32 %v2923_v24, %v644_v46  ;;  %v1551_v30 = vmul.f32 0.020408163, %v1507_v58  ;;  %v1513_v15 = vpop.xlane.xlu2 %1512  ;;  %v3625_v58 = vld [vmem:[%s2726_s18 + $0x100] sm:$0xff] }
 0x2cc   : > { %v1553_v10 = vmul.f32 0.020408163, %v1513_v15 }
 0x2cd   : > { %v756_v13 = vmax.f32 %v740_v38, 0.0  ;;  %v3584_v48 = vadd.f32 1e-05, %v1551_v30  ;;  %v4296_v30 = vld [vmem:[#allocation17_spill] sm:$0xff] }
 0x2ce   : > { %v2257_v26 = vpop.eup %2256  ;;  %v3588_v19 = vadd.f32 1e-05, %v1553_v10 }
 0x2cf   : > { %v1583_v51 = vmul.f32 %v2257_v26, %v1566_v35  ;;  %772 = vst.msk [vmem:[%s3514_s21 + $0x50] sm:$0xff] %vm185_vm0, %v756_v13  ;;  %2262 = vrsqrt.f32 %v3584_v48  ;;  %v3598_v49 = vpop.eup %2258  ;;  %vm1589_vm8 = vweird.f32 %v2257_v26  ;;  %vm1598_vm11 = vweird.f32 %v3584_v48 }
 0x2d0   : > { %2264 = vrsqrt.f32 %v3588_v19  ;;  %1181 = vperm.xlu2 %2188, %v1151_v31   ;;  %v622_v24 = vpop.permute.xlu1 %621  ;;  %v3601_v0 = vpop.eup %2260  ;;  %vm3612_vm9 = vmor %vm1588_vm7, %vm1589_vm8  ;;  %v1603_v3 = vmul.f32 %v3598_v49, %v3573_v11  ;;  %vm1618_vm12 = vweird.f32 %v3588_v19  ;;  %vm1609_vm4 = vweird.f32 %v3598_v49 }
 0x2d1   : > { %v1584_v41 = vmul.f32 %v2257_v26, %v1583_v51  ;;  %v647_v53 = vmul.f32 %v622_v24, %v4291_v32  ;;  %2266 = vrsqrt.f32 %v3594_v33  ;;  %v1633_v27 = vmul.f32 %v3601_v0, %v3576_v23  ;;  %v4297_v24 = vld [vmem:[#allocation52_spill] sm:$0xff]  ;;  %vm3737_vm8 = vmor %vm1608_vm3, %vm1609_vm4 }
 0x2d2   : > { %v1516_v63 = vpop.xlane.xlu0 %1515  ;;  %2268 = vrsqrt.f32 %v3608_v56  ;;  %vm1639_vm2 = vweird.f32 %v3601_v0 }
 0x2d3   : > { %v1585_v28 = vmul.f32 0.5, %v1584_v41  ;;  %v743_v42 = vadd.f32 %v4292_v18, %v647_v53  ;;  %v1522_v54 = vpop.xlane.xlu2 %1521  ;;  %v1554_v2 = vmul.f32 0.020408163, %v1516_v63  ;;  %v1634_v63 = vmul.f32 %v3601_v0, %v1633_v27  ;;  %vm3721_vm5 = vmor %vm1638_vm1, %vm1639_vm2 }
 0x2d5   : > { %v3603_v5 = vpop.eup %2262  ;;  %v1586_v50 = vsub.f32 1.5, %v1585_v28  ;;  %v759_v47 = vmax.f32 %v743_v42, 0.0  ;;  %v3632_v1 = vadd.f32 1e-05, %v1554_v2  ;;  %v1564_v28 = vmul.f32 0.020408163, %v3450_v20 }
 0x2d6   : > { %v3606_v21 = vpop.eup %2264  ;;  %v1593_v6 = vmul.f32 %v3603_v5, %v3584_v48  ;;  %v1556_v42 = vmul.f32 0.020408163, %v1522_v54  ;;  %vm1599_vm10 = vweird.f32 %v3603_v5  ;;  %v3657_v20 = vld [vmem:[%s2726_s18 + $0x108] sm:$0xff] }
 0x2d7   : > { %v1613_v35 = vmul.f32 %v3606_v21, %v3588_v19  ;;  %775 = vst.msk [vmem:[%s3514_s21 + $0x68] sm:$0xff] %vm185_vm0, %v759_v47  ;;  %v1587_v46 = vmul.f32 %v2257_v26, %v1586_v50  ;;  %v3636_v31 = vpop.eup %2266  ;;  %2270 = vrsqrt.f32 %v3632_v1  ;;  %vm1619_vm13 = vweird.f32 %v3606_v21  ;;  %vm1600_vm14 = vmor %vm1598_vm11, %vm1599_vm10 }
 0x2d8   : > { %v1594_v60 = vmul.f32 %v3603_v5, %v1593_v6  ;;  %1191 = vperm.xlu2 %2188, %v4295_v62   ;;  %v1177_v7 = vpop.permute.xlu1 %1176  ;;  %v1604_v6 = vmul.f32 %v3598_v49, %v1603_v3  ;;  %v1663_v2 = vmul.f32 %v3636_v31, %v3594_v33  ;;  %v3659_v54 = vpop.eup %2268  ;;  %v3663_v27 = vadd.f32 1e-05, %v1556_v42  ;;  %vm3676_vm15 = vmor %vm1618_vm12, %vm1619_vm13 }
 0x2d9   : > { %v1614_v38 = vmul.f32 %v3606_v21, %v1613_v35  ;;  %v1246_v15 = vmul.f32 %v1177_v7, %v4296_v30  ;;  %v1591_v43 = vsel %vm3612_vm9, %v2257_v26, %v1587_v46  ;;  %v1635_v35 = vmul.f32 0.5, %v1634_v63  ;;  %v4299_v46 = vld [vmem:[#allocation20_spill] sm:$0xff] }
 0x2da   : > { %v1595_v10 = vmul.f32 0.5, %v1594_v60  ;;  %v1525_v13 = vpop.xlane.xlu0 %1524  ;;  %v1759_v59 = vmul.f32 %v3625_v58, %v1591_v43  ;;  %v4298_v60 = vld [vmem:[#allocation33_spill] sm:$0xff]  ;;  %v3666_v62 = vadd.f32 1e-05, %v1564_v28  ;;  %v1605_v30 = vmul.f32 0.5, %v1604_v6 }
 0x2db   : > { %v1615_v51 = vmul.f32 0.5, %v1614_v38  ;;  %v1342_v41 = vadd.f32 %v4297_v24, %v1246_v15  ;;  %v1557_v32 = vmul.f32 0.020408163, %v1525_v13  ;;  %v1531_v53 = vpop.xlane.xlu2 %1530  ;;  %v1664_v15 = vmul.f32 %v3636_v31, %v1663_v2 }
 0x2dc   : > { %v1596_v18 = vsub.f32 1.5, %v1595_v10  ;;  %1777 = vperm.xlu0 %2186, %v1759_v59   ;;  %v1636_v59 = vsub.f32 1.5, %v1635_v35  ;;  %v1693_v63 = vmul.f32 %v3659_v54, %v3608_v56  ;;  %v1559_v19 = vmul.f32 0.020408163, %v1531_v53 }
 0x2dd   : > { %v1616_v26 = vsub.f32 1.5, %v1615_v51  ;;  %v1358_v50 = vmax.f32 %v1342_v41, 0.0  ;;  %v3643_v47 = vadd.f32 1e-05, %v1557_v32  ;;  %v4302_v51 = vld [vmem:[#allocation55_spill] sm:$0xff]  ;;  %v1606_v6 = vsub.f32 1.5, %v1605_v30 }
 0x2de   : > { %v1597_v4 = vmul.f32 %v3603_v5, %v1596_v18  ;;  %v1665_v2 = vmul.f32 0.5, %v1664_v15  ;;  %vm1669_vm7 = vweird.f32 %v3636_v31  ;;  %v4310_v30 = vld [vmem:[#allocation36_spill] sm:$0xff]  ;;  %vm1698_vm13 = vweird.f32 %v3608_v56 }
 0x2df   : > { %2110 = vst.msk [vmem:[%s3514_s21 + $0x90] sm:$0xff] %vm185_vm0, %v1358_v50  ;;  %2272 = vrsqrt.f32 %v3643_v47  ;;  %v1617_v7 = vmul.f32 %v3606_v21, %v1616_v26  ;;  %v3696_v50 = vld [vmem:[%s2726_s18 + $0x118] sm:$0xff]  ;;  %vm3762_vm10 = vmor %vm1668_vm6, %vm1669_vm7  ;;  %vm1658_vm11 = vweird.f32 %v3643_v47  ;;  %vm1648_vm7 = vweird.f32 %v3663_v27 }
 0x2e0   : > { %1201 = vperm.xlu2 %2188, %v4298_v60   ;;  %v1187_v48 = vpop.permute.xlu1 %1186  ;;  %v1601_v38 = vsel %vm1600_vm14, %v3603_v5, %v1597_v4  ;;  %v3682_v5 = vpop.eup %2270  ;;  %2274 = vrsqrt.f32 %v3663_v27  ;;  %v3709_v60 = vadd.f32 1e-05, %v1559_v19  ;;  %v1666_v15 = vsub.f32 1.5, %v1665_v2  ;;  %v3750_v2 = vld [vmem:[%s2726_s18 + $0x128] sm:$0xff] }
 0x2e1   : > { %v1248_v3 = vmul.f32 %v1187_v48, %v4299_v46  ;;  %v1760_v43 = vmul.f32 %v3657_v20, %v1601_v38  ;;  %2276 = vrsqrt.f32 %v3666_v62  ;;  %v1621_v26 = vsel %vm3676_vm15, %v3606_v21, %v1617_v7  ;;  %v4303_v48 = vld [vmem:[#allocation34_spill] sm:$0xff] }
 0x2e2   : > { %v1534_v13 = vpop.xlane.xlu0 %1533  ;;  %v1623_v53 = vmul.f32 %v3682_v5, %v3632_v1  ;;  %v1694_v21 = vmul.f32 %v3659_v54, %v1693_v63  ;;  %v1762_v7 = vmul.f32 %v3696_v50, %v1621_v26  ;;  %v1637_v46 = vmul.f32 %v3601_v0, %v1636_v59 }
 0x2e3   : > { %v1344_v24 = vadd.f32 %v4302_v51, %v1248_v3  ;;  %v1560_v41 = vmul.f32 0.020408163, %v1534_v13  ;;  %v1540_v32 = vpop.xlane.xlu2 %1539  ;;  %1782 = vperm.xlu1 %2187, %v1760_v43   ;;  %v1607_v38 = vmul.f32 %v3598_v49, %v1606_v6  ;;  %v1667_v11 = vmul.f32 %v3636_v31, %v1666_v15 }
 0x2e4   : > { %v1624_v51 = vmul.f32 %v3682_v5, %v1623_v53  ;;  %v1695_v23 = vmul.f32 0.5, %v1694_v21  ;;  %v1641_v6 = vsel %vm3721_vm5, %v3601_v0, %v1637_v46  ;;  %vm1699_vm15 = vweird.f32 %v3659_v54 }
 0x2e5   : > { %v3687_v28 = vpop.eup %2272  ;;  %v1360_v18 = vmax.f32 %v1344_v24, 0.0  ;;  %v3690_v42 = vadd.f32 1e-05, %v1560_v41  ;;  %v1562_v24 = vmul.f32 0.020408163, %v1540_v32  ;;  %v1764_v33 = vmul.f32 %v3750_v2, %v1641_v6  ;;  %vm3828_vm4 = vmor %vm1698_vm13, %vm1699_vm15 }
 0x2e6   : > { %v1653_v4 = vmul.f32 %v3687_v28, %v3643_v47  ;;  %v3715_v3 = vpop.eup %2274  ;;  %vm1659_vm9 = vweird.f32 %v3687_v28  ;;  %v1625_v0 = vmul.f32 0.5, %v1624_v51  ;;  %v1611_v15 = vsel %vm3737_vm8, %v3598_v49, %v1607_v38 }
 0x2e7   : > { %2112 = vst.msk [vmem:[%s3514_s21 + $0xa0] sm:$0xff] %vm185_vm0, %v1360_v18  ;;  %2278 = vrsqrt.f32 %v3690_v42  ;;  %v3725_v43 = vpop.eup %2276  ;;  %v1643_v32 = vmul.f32 %v3715_v3, %v3663_v27  ;;  %vm1660_vm12 = vmor %vm1658_vm11, %vm1659_vm9  ;;  %v1696_v47 = vsub.f32 1.5, %v1695_v23  ;;  %vm1688_vm1 = vweird.f32 %v3690_v42 }
 0x2e8   : > { %v1654_v35 = vmul.f32 %v3687_v28, %v1653_v4  ;;  %1216 = vperm.xlu2 %2188, %v4303_v48   ;;  %2280 = vrsqrt.f32 %v3709_v60  ;;  %v1723_v4 = vmul.f32 %v3725_v43, %v3666_v62  ;;  %v3767_v48 = vadd.f32 1e-05, %v1562_v24 }
 0x2e9   : > { %vm1629_vm2 = vweird.f32 %v3682_v5  ;;  %vm1628_vm5 = vweird.f32 %v3632_v1  ;;  %vm1649_vm8 = vweird.f32 %v3715_v3  ;;  %vm1729_vm13 = vweird.f32 %v3725_v43 }
 0x2ea   : > { %v1655_v10 = vmul.f32 0.5, %v1654_v35  ;;  %v1543_v13 = vpop.xlane.xlu0 %1542  ;;  %vm3835_vm6 = vmor %vm1628_vm5, %vm1629_vm2 }
 0x2eb   : > { %v1563_v41 = vmul.f32 0.020408163, %v1543_v13  ;;  %v1549_v59 = vpop.xlane.xlu2 %1548  ;;  %1792 = vperm.xlu1 %2187, %v1762_v7   ;;  %v3771_v7 = vld [vmem:[%s2726_s18 + $0x138] sm:$0xff]  ;;  %v1644_v13 = vmul.f32 %v3715_v3, %v1643_v32  ;;  %v4311_v32 = vld [vmem:[#allocation2_spill] sm:$0xff] }
 0x2ec   : > { %v1656_v63 = vsub.f32 1.5, %v1655_v10  ;;  %v3780_v10 = vld [vmem:[%s2726_s18 + $0x110] sm:$0xff]  ;;  %v1565_v18 = vmul.f32 0.020408163, %v1549_v59 }
 0x2ed   : > { %v3731_v19 = vpop.eup %2278  ;;  %v3744_v26 = vadd.f32 1e-05, %v1563_v41  ;;  %v1724_v41 = vmul.f32 %v3725_v43, %v1723_v4  ;;  %v1761_v38 = vmul.f32 %v3780_v10, %v1611_v15  ;;  %v3811_v15 = vld [vmem:[%s2726_s18 + $0x150] sm:$0xff] }
 0x2ee   : > { %v1683_v53 = vmul.f32 %v3731_v19, %v3690_v42  ;;  %v1657_v21 = vmul.f32 %v3687_v28, %v1656_v63  ;;  %v3784_v24 = vpop.eup %2280  ;;  %vm1689_vm14 = vweird.f32 %v3731_v19 }
 0x2ef   : > { %2282 = vrsqrt.f32 %v3744_v26  ;;  %vm1690_vm3 = vmor %vm1688_vm1, %vm1689_vm14  ;;  %vm1718_vm11 = vweird.f32 %v3744_v26  ;;  %vm1678_vm1 = vweird.f32 %v3709_v60  ;;  %vm1679_vm2 = vweird.f32 %v3784_v24 }
 0x2f0   : > { %v1684_v46 = vmul.f32 %v3731_v19, %v1683_v53  ;;  %1231 = vperm.xlu2 %2188, %v4310_v30   ;;  %v1661_v51 = vsel %vm1660_vm12, %v3687_v28, %v1657_v21  ;;  %v1626_v53 = vsub.f32 1.5, %v1625_v0  ;;  %2284 = vrsqrt.f32 %v3767_v48  ;;  %v3797_v21 = vld [vmem:[%s2726_s18 + $0x140] sm:$0xff] }
 0x2f1   : > { %v1766_v6 = vmul.f32 %v3771_v7, %v1661_v51  ;;  %v1671_v28 = vsel %vm3762_vm10, %v3636_v31, %v1667_v11  ;;  %v1645_v30 = vmul.f32 0.5, %v1644_v13  ;;  %v1673_v31 = vmul.f32 %v3784_v24, %v3709_v60  ;;  %v4312_v11 = vld [vmem:[#allocation37_spill] sm:$0xff]  ;;  %vm3867_vm10 = vmor %vm1648_vm7, %vm1649_vm8 }
 0x2f2   : > { %v1685_v63 = vmul.f32 0.5, %v1684_v46  ;;  %v1697_v46 = vmul.f32 %v3659_v54, %v1696_v47  ;;  %v1725_v51 = vmul.f32 0.5, %v1724_v41  ;;  %v1627_v47 = vmul.f32 %v3682_v5, %v1626_v53 }
 0x2f3   : > { %v557_v49 = vpop.permute.xlu2 %556  ;;  %1802 = vperm.xlu1 %2187, %v1764_v33   ;;  %1812 = vperm.xlu0 %2186, %v1766_v6   ;;  %v1767_v42 = vmul.f32 %v3797_v21, %v1671_v28  ;;  %v1646_v28 = vsub.f32 1.5, %v1645_v30  ;;  %vm1728_vm12 = vweird.f32 %v3666_v62 }
 0x2f4   : > { %v1686_v23 = vsub.f32 1.5, %v1685_v63  ;;  %v634_v4 = vmul.f32 %v557_v49, %v4311_v32  ;;  %v3819_v63 = vadd.f32 1e-05, %v1565_v18  ;;  %v1726_v32 = vsub.f32 1.5, %v1725_v51  ;;  %vm3895_vm15 = vmor %vm1728_vm12, %vm1729_vm13 }
 0x2f5   : > { %v3799_v0 = vpop.eup %2282  ;;  %v1631_v1 = vsel %vm3835_vm6, %v3682_v5, %v1627_v47  ;;  %v1701_v5 = vsel %vm3828_vm4, %v3659_v54, %v1697_v46  ;;  %v3861_v47 = vld [vmem:[%s2726_s18 + $0x158] sm:$0xff]  ;;  %v3876_v54 = vld [vmem:[%s2726_s18 + $0x168] sm:$0xff]  ;;  %vm1708_vm4 = vweird.f32 %v3767_v48 }
 0x2f6   : > { %v1713_v59 = vmul.f32 %v3799_v0, %v3744_v26  ;;  %v730_v35 = vadd.f32 %v4312_v11, %v634_v4  ;;  %v1687_v33 = vmul.f32 %v3731_v19, %v1686_v23  ;;  %v3822_v41 = vpop.eup %2284  ;;  %v1674_v23 = vmul.f32 %v3784_v24, %v1673_v31  ;;  %v3847_v4 = vld [vmem:[%s2726_s18 + $0x120] sm:$0xff]  ;;  %v4317_v31 = vld [vmem:[#allocation4_spill] sm:$0xff] }
 0x2f7   : > { %vm1719_vm9 = vweird.f32 %v3799_v0  ;;  %2286 = vrsqrt.f32 %v3819_v63  ;;  %v1647_v11 = vmul.f32 %v3715_v3, %v1646_v28  ;;  %v1727_v27 = vmul.f32 %v3725_v43, %v1726_v32 }
 0x2f8   : > { %v1714_v13 = vmul.f32 %v3799_v0, %v1713_v59  ;;  %v746_v6 = vmax.f32 %v730_v35, 0.0  ;;  %1787 = vperm.xlu2 %2188, %v1761_v38   ;;  %v1691_v49 = vsel %vm1690_vm3, %v3731_v19, %v1687_v33  ;;  %v1675_v35 = vmul.f32 0.5, %v1674_v23  ;;  %vm1720_vm14 = vmor %vm1718_vm11, %vm1719_vm9 }
 0x2f9   : > { %v1769_v38 = vmul.f32 %v3811_v15, %v1691_v49  ;;  %v1703_v33 = vmul.f32 %v3822_v41, %v3767_v48  ;;  %v1763_v49 = vmul.f32 %v3847_v4, %v1631_v1  ;;  %v1770_v46 = vmul.f32 %v3861_v47, %v1701_v5  ;;  %v4323_v1 = vld [vmem:[#allocation6_spill] sm:$0xff]  ;;  %vm3914_vm3 = vmor %vm1678_vm1, %vm1679_vm2 }
 0x2fa   : > { %v1715_v19 = vmul.f32 0.5, %v1714_v13  ;;  %762 = vst.msk [vmem:[%s3514_s21] sm:$0xff] %vm185_vm0, %v746_v6  ;;  %v4320_v13 = vld [vmem:[#allocation39_spill] sm:$0xff]  ;;  %v1676_v23 = vsub.f32 1.5, %v1675_v35  ;;  %v1651_v62 = vsel %vm3867_vm10, %v3715_v3, %v1647_v11  ;;  %v1731_v60 = vsel %vm3895_vm15, %v3725_v43, %v1727_v27  ;;  %v4330_v48 = vld [vmem:[#allocation10_spill] sm:$0xff] }
 0x2fb   : > { %v572_v56 = vpop.permute.xlu2 %571  ;;  %1817 = vperm.xlu1 %2187, %v1767_v42   ;;  %1827 = vperm.xlu0 %2186, %v1769_v38   ;;  %v1704_v38 = vmul.f32 %v3822_v41, %v1703_v33  ;;  %v3912_v33 = vld [vmem:[%s2726_s18 + $0x170] sm:$0xff]  ;;  %vm1709_vm5 = vweird.f32 %v3822_v41  ;;  %v4329_v32 = vmov 1   ;;  %v2152_v5 = vld [vmem:[%s2726_s18 + $0x160] sm:$0xff]  ;;  %vm1738_vm7 = vweird.f32 %v3819_v63 }
 0x2fc   : > { %v1716_v30 = vsub.f32 1.5, %v1715_v19  ;;  %v637_v59 = vmul.f32 %v572_v56, %v4317_v31  ;;  %v3891_v19 = vld [vmem:[%s2726_s18 + $0x130] sm:$0xff]  ;;  %v1677_v31 = vmul.f32 %v3784_v24, %v1676_v23  ;;  %vm1710_vm6 = vmor %vm1708_vm4, %vm1709_vm5 }
 0x2fd   : > { %v3855_v51 = vpop.permute.xlu0 %561  ;;  %v3893_v56 = vpop.eup %2286  ;;  %v4326_v42 = vld [vmem:[#allocation40_spill] sm:$0xff] }
 0x2fe   : > { %v733_v6 = vadd.f32 %v4320_v13, %v637_v59  ;;  %v1717_v53 = vmul.f32 %v3799_v0, %v1716_v30  ;;  %v1765_v30 = vmul.f32 %v3891_v19, %v1651_v62  ;;  %v1705_v59 = vmul.f32 0.5, %v1704_v38  ;;  %v2149_v38 = vld [vmem:[%s2726_s18 + $0x148] sm:$0xff] }
 0x2ff   : > { %v1733_v11 = vmul.f32 %v3893_v56, %v3819_v63  ;;  %v1681_v27 = vsel %vm3914_vm3, %v3784_v24, %v1677_v31  ;;  %vm1739_vm8 = vweird.f32 %v3893_v56 }
 0x300   : > { %v749_v26 = vmax.f32 %v733_v6, 0.0  ;;  %1797 = vperm.xlu2 %2188, %v1763_v49   ;;  %v1721_v28 = vsel %vm1720_vm14, %v3799_v0, %v1717_v53  ;;  %v4327_v6 = vld [vmem:[#allocation7_spill] sm:$0xff]  ;;  %v1706_v23 = vsub.f32 1.5, %v1705_v59  ;;  %v4331_v59 = vld [vmem:[#allocation46_spill] sm:$0xff]  ;;  %vm1740_vm9 = vmor %vm1738_vm7, %vm1739_vm8 }
 0x301   : > { %v1772_v18 = vmul.f32 %v3876_v54, %v1721_v28  ;;  %v1773_v28 = vmul.f32 %v3912_v33, %v1731_v60  ;;  %v1734_v43 = vmul.f32 %v3893_v56, %v1733_v11 }
 0x302   : > { %765 = vst.msk [vmem:[%s3514_s21 + $0x18] sm:$0xff] %vm185_vm0, %v749_v26  ;;  %v4328_v26 = vld [vmem:[#allocation43_spill] sm:$0xff] }
 0x303   : > { %v577_v0 = vpop.permute.xlu2 %576  ;;  %1832 = vperm.xlu1 %2187, %v1770_v46   ;;  %1842 = vperm.xlu0 %2186, %v1772_v18   ;;  %v1735_v24 = vmul.f32 0.5, %v1734_v43 }
 0x304   : > { %v638_v3 = vmul.f32 %v577_v0, %v4323_v1  ;;  %v1768_v0 = vmul.f32 %v2149_v38, %v1681_v27  ;;  %v1707_v1 = vmul.f32 %v3822_v41, %v1706_v23  ;;  %v2155_v23 = vld [vmem:[%s2726_s18 + $0x178] sm:$0xff] }
 0x305   : > { %v597_v35 = vpop.permute.xlu0 %596 }
 0x306   : > { %v734_v13 = vadd.f32 %v4326_v42, %v638_v3  ;;  %v642_v49 = vmul.f32 %v597_v35, %v4327_v6  ;;  %v2299_v3 = vld [vmem:[%s2726_s18 + $0x8] sm:$0xff]  ;;  %v1736_v35 = vsub.f32 1.5, %v1735_v24  ;;  %v1711_v60 = vsel %vm1710_vm6, %v3822_v41, %v1707_v1 }
 0x307   : > { %v1771_v6 = vmul.f32 %v2152_v5, %v1711_v60 }
 0x308   : > { %v750_v53 = vmax.f32 %v734_v13, 0.0  ;;  %v738_v46 = vadd.f32 %v4328_v26, %v642_v49  ;;  %1807 = vperm.xlu2 %2188, %v1765_v30   ;;  %v1737_v49 = vmul.f32 %v3893_v56, %v1736_v35  ;;  %v4333_v26 = vld [vmem:[#allocation49_spill] sm:$0xff] }
 0x30a   : > { %766 = vst.msk [vmem:[%s3514_s21 + $0x20] sm:$0xff] %vm185_vm0, %v750_v53  ;;  %v754_v18 = vmax.f32 %v738_v46, 0.0  ;;  %v4332_v53 = vld [vmem:[#allocation13_spill] sm:$0xff] }
 0x30b   : > { %v3931_v62 = vpop.permute.xlu2 %586  ;;  %1847 = vperm.xlu1 %2187, %v1773_v28   ;;  %2189 = vset.pattern.permute.xlu0 %v4329_v32  ;;  %v1741_v28 = vsel %vm1740_vm9, %v3893_v56, %v1737_v49 }
 0x30c   : > { %770 = vst.msk [vmem:[%s3514_s21 + $0x40] sm:$0xff] %vm185_vm0, %v754_v18  ;;  %657 = vperm.xlu0 %2189, %v2299_v3   ;;  %v1774_v18 = vmul.f32 %v2155_v23, %v1741_v28  ;;  %v4335_v3 = vld [vmem:[#allocation19_spill] sm:$0xff]  ;;  %v4342_v28 = vld [vmem:[#allocation56_spill] sm:$0xff] }
 0x30d   : > { %v612_v30 = vpop.permute.xlu0 %611 }
 0x30e   : > { %v645_v31 = vmul.f32 %v612_v30, %v4330_v48 }
 0x310   : > { %v741_v11 = vadd.f32 %v4331_v59, %v645_v31  ;;  %1822 = vperm.xlu2 %2188, %v1768_v0   ;;  %v4334_v0 = vld [vmem:[#allocation30_spill] sm:$0xff]  ;;  %v4337_v31 = vld [vmem:[#allocation31_spill] sm:$0xff]  ;;  %v3978_v59 = vpop.permute.xlu1 %1196 }
 0x312   : > { %v757_v42 = vmax.f32 %v741_v11, 0.0 }
 0x313   : > { %v3944_v13 = vpop.permute.xlu2 %601  ;;  %2190 = vset.pattern.permute.xlu1 %v4329_v32 }
 0x314   : > { %773 = vst.msk [vmem:[%s3514_s21 + $0x58] sm:$0xff] %vm185_vm0, %v757_v42  ;;  %1878 = vperm.xlu1 %2190, %v3657_v20   ;;  %682 = vperm.xlu0 %2189, %v3430_v55   ;;  %v4339_v42 = vld [vmem:[#allocation54_spill] sm:$0xff] }
 0x315   : > { %v627_v41 = vpop.permute.xlu0 %626 }
 0x316   : > { %v648_v63 = vmul.f32 %v627_v41, %v4332_v53 }
 0x318   : > { %v744_v46 = vadd.f32 %v4333_v26, %v648_v63  ;;  %1837 = vperm.xlu2 %2188, %v1771_v6   ;;  %v3992_v53 = vpop.permute.xlu1 %1211 }
 0x31a   : > { %v760_v43 = vmax.f32 %v744_v46, 0.0  ;;  %v2300_v46 = vld [vmem:[%s2726_s18 + $0xb0] sm:$0xff] }
 0x31b   : > { %v3956_v27 = vpop.permute.xlu2 %616 }
 0x31c   : > { %776 = vst.msk [vmem:[%s3514_s21 + $0x70] sm:$0xff] %vm185_vm0, %v760_v43  ;;  %1888 = vperm.xlu1 %2190, %v3696_v50   ;;  %697 = vperm.xlu0 %2189, %v3472_v61  }
 0x31d   : > { %v3962_v55 = vpop.permute.xlu0 %1171 }
 0x320   : > { %1852 = vperm.xlu2 %2188, %v1774_v18   ;;  %v4004_v18 = vpop.permute.xlu1 %1226 }
 0x323   : > { %v3964_v20 = vpop.permute.xlu2 %631 }
 0x324   : > { %1903 = vperm.xlu1 %2190, %v3891_v19   ;;  %712 = vperm.xlu0 %2189, %v3506_v12   ;;  %v4336_v19 = vld [vmem:[#allocation51_spill] sm:$0xff] }
 0x325   : > { %v1207_v56 = vpop.permute.xlu0 %1206 }
 0x326   : > { %v1252_v1 = vmul.f32 %v1207_v56, %v4334_v0  ;;  %v4343_v56 = vld [vmem:[#allocation26_spill] sm:$0xff] }
 0x328   : > { %v1348_v24 = vadd.f32 %v2974_v57, %v1252_v1  ;;  %2191 = vset.pattern.permute.xlu2 %v4329_v32  ;;  %v2301_v1 = vld [vmem:[%s2726_s18 + $0xc8] sm:$0xff] }
 0x329   : > { %1883 = vperm.xlu2 %2191, %v3780_v10  }
 0x32a   : > { %v1364_v61 = vmax.f32 %v1348_v24, 0.0 }
 0x32b   : > { %v1167_v50 = vpop.permute.xlu2 %1166 }
 0x32c   : > { %2116 = vst.msk [vmem:[%s3514_s21 + $0xc0] sm:$0xff] %vm185_vm0, %v1364_v61  ;;  %v1244_v30 = vmul.f32 %v1167_v50, %v4335_v3  ;;  %1918 = vperm.xlu1 %2190, %v2149_v38   ;;  %727 = vperm.xlu0 %2189, %v3540_v8   ;;  %v4338_v8 = vld [vmem:[#allocation21_spill] sm:$0xff]  ;;  %v4345_v50 = vld [vmem:[#allocation28_spill] sm:$0xff] }
 0x32d   : > { %v1222_v12 = vpop.permute.xlu0 %1221 }
 0x32e   : > { %v1340_v48 = vadd.f32 %v4336_v19, %v1244_v30  ;;  %v1255_v57 = vmul.f32 %v1222_v12, %v4337_v31  ;;  %v2302_v30 = vld [vmem:[%s2726_s18 + $0xe0] sm:$0xff]  ;;  %v4014_v12 = vpop.permute.xlu1 %1241 }
 0x32f   : > { %v4346_v19 = vld [vmem:[#allocation58_spill] sm:$0xff] }
 0x330   : > { %v1356_v32 = vmax.f32 %v1340_v48, 0.0  ;;  %v1351_v10 = vadd.f32 %v2989_v25, %v1255_v57  ;;  %v4340_v25 = vld [vmem:[#allocation32_spill] sm:$0xff] }
 0x331   : > { %1893 = vperm.xlu2 %2191, %v3847_v4  }
 0x332   : > { %2108 = vst.msk [vmem:[%s3514_s21 + $0x80] sm:$0xff] %vm185_vm0, %v1356_v32  ;;  %v1367_v11 = vmax.f32 %v1351_v10, 0.0  ;;  %v4347_v32 = vld [vmem:[#allocation29_spill] sm:$0xff] }
 0x333   : > { %v1182_v38 = vpop.permute.xlu2 %1181 }
 0x334   : > { %2119 = vst.msk [vmem:[%s3514_s21 + $0xd8] sm:$0xff] %vm185_vm0, %v1367_v11  ;;  %v1247_v35 = vmul.f32 %v1182_v38, %v4338_v8  ;;  %1933 = vperm.xlu1 %2190, %v2152_v5   ;;  %1267 = vperm.xlu0 %2189, %v3456_v37   ;;  %v4341_v37 = vld [vmem:[#allocation23_spill] sm:$0xff]  ;;  %v2303_v11 = vld [vmem:[%s2726_s18 + $0xf8] sm:$0xff] }
 0x335   : > { %v1237_v60 = vpop.permute.xlu0 %1236 }
 0x336   : > { %v1343_v6 = vadd.f32 %v4339_v42, %v1247_v35  ;;  %v1258_v49 = vmul.f32 %v1237_v60, %v4340_v25 }
 0x338   : > { %v1359_v4 = vmax.f32 %v1343_v6, 0.0  ;;  %v1354_v41 = vadd.f32 %v3003_v22, %v1258_v49 }
 0x339   : > { %1908 = vperm.xlu2 %2191, %v3771_v7  }
 0x33a   : > { %2111 = vst.msk [vmem:[%s3514_s21 + $0x98] sm:$0xff] %vm185_vm0, %v1359_v4  ;;  %v1370_v63 = vmax.f32 %v1354_v41, 0.0 }
 0x33b   : > { %v1192_v5 = vpop.permute.xlu2 %1191 }
 0x33c   : > { %2122 = vst.msk [vmem:[%s3514_s21 + $0xf0] sm:$0xff] %vm185_vm0, %v1370_v63  ;;  %v1249_v26 = vmul.f32 %v1192_v5, %v4341_v37  ;;  %1948 = vperm.xlu1 %2190, %v2155_v23   ;;  %1292 = vperm.xlu0 %2189, %v2300_v46   ;;  %v4344_v23 = vld [vmem:[#allocation57_spill] sm:$0xff] }
 0x33e   : > { %v1345_v22 = vadd.f32 %v4342_v28, %v1249_v26 }
 0x340   : > { %v1361_v43 = vmax.f32 %v1345_v22, 0.0 }
 0x341   : > { %1923 = vperm.xlu2 %2191, %v3811_v15  }
 0x342   : > { %2113 = vst.msk [vmem:[%s3514_s21 + $0xa8] sm:$0xff] %vm185_vm0, %v1361_v43 }
 0x343   : > { %v1202_v7 = vpop.permute.xlu2 %1201 }
 0x344   : > { %v1251_v0 = vmul.f32 %v1202_v7, %v4343_v56  ;;  %1307 = vperm.xlu0 %2189, %v2301_v1  }
 0x346   : > { %v1347_v24 = vadd.f32 %v4344_v23, %v1251_v0  ;;  %v4350_v23 = vld [vmem:[#allocation44_spill] sm:$0xff] }
 0x348   : > { %v1363_v61 = vmax.f32 %v1347_v24, 0.0 }
 0x349   : > { %1938 = vperm.xlu2 %2191, %v3876_v54  }
 0x34a   : > { %2115 = vst.msk [vmem:[%s3514_s21 + $0xb8] sm:$0xff] %vm185_vm0, %v1363_v61 }
 0x34b   : > { %v1217_v15 = vpop.permute.xlu2 %1216 }
 0x34c   : > { %v1254_v3 = vmul.f32 %v1217_v15, %v4345_v50  ;;  %1322 = vperm.xlu0 %2189, %v2302_v30  }
 0x34e   : > { %v1350_v48 = vadd.f32 %v4346_v19, %v1254_v3  ;;  %v4025_v60 = vpop.permute.xlu0 %1777 }
 0x350   : > { %v1366_v31 = vmax.f32 %v1350_v48, 0.0 }
 0x352   : > { %2118 = vst.msk [vmem:[%s3514_s21 + $0xd0] sm:$0xff] %vm185_vm0, %v1366_v31 }
 0x353   : > { %v1232_v57 = vpop.permute.xlu2 %1231 }
 0x354   : > { %v1257_v10 = vmul.f32 %v1232_v57, %v4347_v32  ;;  %1337 = vperm.xlu0 %2189, %v2303_v11  }
 0x355   : > { %v1783_v38 = vpop.permute.xlu1 %1782 }
 0x356   : > { %v1353_v54 = vadd.f32 %v2993_v34, %v1257_v10  ;;  %v1856_v56 = vmul.f32 %v1783_v38, %v3037_v39 }
 0x358   : > { %v1369_v8 = vmax.f32 %v1353_v54, 0.0 }
 0x35a   : > { %2121 = vst.msk [vmem:[%s3514_s21 + $0xe8] sm:$0xff] %vm185_vm0, %v1369_v8 }
 0x35b   : > { %v1788_v35 = vpop.permute.xlu2 %1787 }
 0x35c   : > { %1873 = vperm.xlu0 %2189, %v3625_v58   ;;  %v1857_v24 = vmul.f32 %v1788_v35, %v4350_v23 }
 0x35d   : > { %v1793_v42 = vpop.permute.xlu1 %1792 }
 0x35e   : > { %v1858_v30 = vmul.f32 %v1793_v42, %v3042_v14  ;;  %v4352_v14 = vld [vmem:[#allocation14_spill] sm:$0xff] }
 0x363   : > { %v1798_v6 = vpop.permute.xlu2 %1797 }
 0x364   : > { %1898 = vperm.xlu0 %2189, %v3750_v2   ;;  %v4348_v2 = vld [vmem:[#allocation5_spill] sm:$0xff]  ;;  %v1859_v10 = vmul.f32 %v1798_v6, %v3069_v17 }
 0x365   : > { %v4028_v25 = vpop.permute.xlu1 %1802  ;;  %v1813_v49 = vpop.permute.xlu0 %1812  ;;  %v635_v26 = vmul.f32 %v3855_v51, %v4348_v2 }
 0x36b   : > { %v1808_v4 = vpop.permute.xlu2 %1807 }
 0x36c   : > { %1913 = vperm.xlu0 %2189, %v3797_v21   ;;  %v1861_v35 = vmul.f32 %v1808_v4, %v3074_v9  ;;  %v4353_v9 = vld [vmem:[#allocation16_spill] sm:$0xff] }
 0x36d   : > { %v4031_v34 = vpop.permute.xlu1 %1817  ;;  %v4033_v41 = vpop.permute.xlu0 %1827 }
 0x373   : > { %v1823_v63 = vpop.permute.xlu2 %1822 }
 0x374   : > { %1928 = vperm.xlu0 %2189, %v3861_v47   ;;  %v4349_v47 = vld [vmem:[#allocation8_spill] sm:$0xff]  ;;  %v1864_v4 = vmul.f32 %v1823_v63, %v3112_v36  ;;  %v4354_v36 = vld [vmem:[#allocation18_spill] sm:$0xff] }
 0x375   : > { %v4036_v58 = vpop.permute.xlu1 %1832  ;;  %v4038_v5 = vpop.permute.xlu0 %1842  ;;  %v640_v7 = vmul.f32 %v3931_v62, %v4349_v47  ;;  %v4351_v62 = vld [vmem:[#allocation11_spill] sm:$0xff]  ;;  %v1245_v63 = vmul.f32 %v3962_v55, %v4354_v36 }
 0x376   : > { %v643_v39 = vmul.f32 %v3944_v13, %v4351_v62  ;;  %v646_v13 = vmul.f32 %v3956_v27, %v4352_v14  ;;  %v649_v27 = vmul.f32 %v3964_v20, %v4353_v9  ;;  %v1868_v62 = vmul.f32 %v4038_v5, %v3187_v45 }
 0x37b   : > { %v4040_v37 = vpop.permute.xlu2 %1837 }
 0x37c   : > { %1943 = vperm.xlu0 %2189, %v3912_v33  }
 0x37d   : > { %v4045_v46 = vpop.permute.xlu1 %1847 }
 0x37e   : > { %v658_v21 = vpop.permute.xlu0 %657 }
 0x37f   : > { %v731_v28 = vadd.f32 %v658_v21, %v635_v26  ;;  %v1862_v21 = vmul.f32 %v1813_v49, %v3105_v52 }
 0x381   : > { %v747_v22 = vmax.f32 %v731_v28, 0.0 }
 0x383   : > { %v4047_v43 = vpop.permute.xlu2 %1852  ;;  %763 = vst.msk [vmem:[%s3514_s21 + $0x8] sm:$0xff] %vm185_vm0, %v747_v22 }
 0x386   : > { %v1879_v33 = vpop.permute.xlu1 %1878  ;;  %v683_v0 = vpop.permute.xlu0 %682 }
 0x387   : > { %v1952_v51 = vadd.f32 %v1879_v33, %v1856_v56  ;;  %v736_v1 = vadd.f32 %v683_v0, %v640_v7 }
 0x389   : > { %v1968_v61 = vmax.f32 %v1952_v51, 0.0  ;;  %v752_v15 = vmax.f32 %v736_v1, 0.0  ;;  %v1865_v51 = vmul.f32 %v4033_v41, %v3142_v29 }
 0x38b   : > { %v1884_v50 = vpop.permute.xlu2 %1883  ;;  %2157 = vst.msk [vmem:[%s3514_s21 + $0x108] sm:$0xff] %vm185_vm0, %v1968_v61  ;;  %v1867_v61 = vmul.f32 %v4040_v37, %v3148_v44  ;;  %v4355_v44 = vld [vmem:[#allocation22_spill] sm:$0xff] }
 0x38c   : > { %v1953_v3 = vadd.f32 %v1884_v50, %v1857_v24  ;;  %768 = vst.msk [vmem:[%s3514_s21 + $0x30] sm:$0xff] %vm185_vm0, %v752_v15  ;;  %v1250_v37 = vmul.f32 %v3978_v59, %v4355_v44  ;;  %v4356_v59 = vld [vmem:[#allocation24_spill] sm:$0xff] }
 0x38e   : > { %v1969_v19 = vmax.f32 %v1953_v3, 0.0  ;;  %v1889_v48 = vpop.permute.xlu1 %1888  ;;  %v698_v31 = vpop.permute.xlu0 %697 }
 0x38f   : > { %v1954_v57 = vadd.f32 %v1889_v48, %v1858_v30  ;;  %v739_v32 = vadd.f32 %v698_v31, %v643_v39  ;;  %v1870_v48 = vmul.f32 %v4047_v43, %v3193_v40 }
 0x390   : > { %2158 = vst.msk [vmem:[%s3514_s21 + $0x110] sm:$0xff] %vm185_vm0, %v1969_v19 }
 0x391   : > { %v1970_v11 = vmax.f32 %v1954_v57, 0.0  ;;  %v755_v54 = vmax.f32 %v739_v32, 0.0 }
 0x393   : > { %v1894_v38 = vpop.permute.xlu2 %1893  ;;  %2159 = vst.msk [vmem:[%s3514_s21 + $0x118] sm:$0xff] %vm185_vm0, %v1970_v11 }
 0x394   : > { %v1955_v8 = vadd.f32 %v1894_v38, %v1859_v10  ;;  %771 = vst.msk [vmem:[%s3514_s21 + $0x48] sm:$0xff] %vm185_vm0, %v755_v54  ;;  %v1253_v54 = vmul.f32 %v3992_v53, %v4356_v59 }
 0x396   : > { %v1971_v42 = vmax.f32 %v1955_v8, 0.0  ;;  %v1904_v2 = vpop.permute.xlu1 %1903  ;;  %v713_v26 = vpop.permute.xlu0 %712  ;;  %v4357_v8 = vld [vmem:[#allocation25_spill] sm:$0xff] }
 0x397   : > { %v1957_v17 = vadd.f32 %v1904_v2, %v1861_v35  ;;  %v742_v6 = vadd.f32 %v713_v26, %v646_v13  ;;  %v1256_v14 = vmul.f32 %v4004_v18, %v4357_v8  ;;  %v4358_v2 = vld [vmem:[#allocation27_spill] sm:$0xff] }
 0x398   : > { %2160 = vst.msk [vmem:[%s3514_s21 + $0x120] sm:$0xff] %vm185_vm0, %v1971_v42  ;;  %v1259_v26 = vmul.f32 %v4014_v12, %v4358_v2 }
 0x399   : > { %v1973_v28 = vmax.f32 %v1957_v17, 0.0  ;;  %v758_v22 = vmax.f32 %v742_v6, 0.0 }
 0x39b   : > { %v1909_v47 = vpop.permute.xlu2 %1908  ;;  %2162 = vst.msk [vmem:[%s3514_s21 + $0x130] sm:$0xff] %vm185_vm0, %v1973_v28 }
 0x39c   : > { %v1958_v7 = vadd.f32 %v1909_v47, %v1862_v21  ;;  %774 = vst.msk [vmem:[%s3514_s21 + $0x60] sm:$0xff] %vm185_vm0, %v758_v22  ;;  %v1855_v21 = vmul.f32 %v4025_v60, %v3013_v16  ;;  %v4359_v47 = vld [vmem:[#allocation45_spill] sm:$0xff] }
 0x39e   : > { %v1974_v56 = vmax.f32 %v1958_v7, 0.0  ;;  %v1919_v33 = vpop.permute.xlu1 %1918  ;;  %v728_v0 = vpop.permute.xlu0 %727  ;;  %v1860_v7 = vmul.f32 %v4028_v25, %v4359_v47 }
 0x39f   : > { %v1960_v52 = vadd.f32 %v1919_v33, %v1864_v4  ;;  %v745_v49 = vadd.f32 %v728_v0, %v649_v27  ;;  %v4360_v4 = vld [vmem:[#allocation47_spill] sm:$0xff]  ;;  %v4361_v0 = vld [vmem:[#allocation50_spill] sm:$0xff] }
 0x3a0   : > { %2163 = vst.msk [vmem:[%s3514_s21 + $0x138] sm:$0xff] %vm185_vm0, %v1974_v56  ;;  %v1863_v56 = vmul.f32 %v4031_v34, %v4360_v4 }
 0x3a1   : > { %v1976_v1 = vmax.f32 %v1960_v52, 0.0  ;;  %v761_v23 = vmax.f32 %v745_v49, 0.0  ;;  %v1866_v52 = vmul.f32 %v4036_v58, %v4361_v0 }
 0x3a3   : > { %v1924_v24 = vpop.permute.xlu2 %1923  ;;  %2165 = vst.msk [vmem:[%s3514_s21 + $0x148] sm:$0xff] %vm185_vm0, %v1976_v1  ;;  %v4362_v1 = vld [vmem:[#allocation53_spill] sm:$0xff] }
 0x3a4   : > { %v1961_v20 = vadd.f32 %v1924_v24, %v1865_v51  ;;  %777 = vst.msk [vmem:[%s3514_s21 + $0x78] sm:$0xff] %vm185_vm0, %v761_v23  ;;  %v1869_v23 = vmul.f32 %v4045_v46, %v4362_v1 }
 0x3a6   : > { %v1977_v15 = vmax.f32 %v1961_v20, 0.0  ;;  %v1934_v50 = vpop.permute.xlu1 %1933  ;;  %v1268_v3 = vpop.permute.xlu0 %1267 }
 0x3a7   : > { %v1963_v29 = vadd.f32 %v1934_v50, %v1867_v61  ;;  %v1341_v41 = vadd.f32 %v1268_v3, %v1245_v63 }
 0x3a8   : > { %2166 = vst.msk [vmem:[%s3514_s21 + $0x150] sm:$0xff] %vm185_vm0, %v1977_v15 }
 0x3a9   : > { %v1979_v39 = vmax.f32 %v1963_v29, 0.0  ;;  %v1357_v30 = vmax.f32 %v1341_v41, 0.0 }
 0x3ab   : > { %v1939_v19 = vpop.permute.xlu2 %1938  ;;  %2168 = vst.msk [vmem:[%s3514_s21 + $0x160] sm:$0xff] %vm185_vm0, %v1979_v39 }
 0x3ac   : > { %v1964_v55 = vadd.f32 %v1939_v19, %v1868_v62  ;;  %2109 = vst.msk [vmem:[%s3514_s21 + $0x88] sm:$0xff] %vm185_vm0, %v1357_v30 }
 0x3ae   : > { %v1980_v31 = vmax.f32 %v1964_v55, 0.0  ;;  %v1949_v57 = vpop.permute.xlu1 %1948  ;;  %v1293_v45 = vpop.permute.xlu0 %1292 }
 0x3af   : > { %v1966_v5 = vadd.f32 %v1949_v57, %v1870_v48  ;;  %v1346_v32 = vadd.f32 %v1293_v45, %v1250_v37 }
 0x3b0   : > { %2169 = vst.msk [vmem:[%s3514_s21 + $0x168] sm:$0xff] %vm185_vm0, %v1980_v31 }
 0x3b1   : > { %v1982_v10 = vmax.f32 %v1966_v5, 0.0  ;;  %v1362_v11 = vmax.f32 %v1346_v32, 0.0 }
 0x3b3   : > { %2171 = vst.msk [vmem:[%s3514_s21 + $0x178] sm:$0xff] %vm185_vm0, %v1982_v10 }
 0x3b4   : > { %2114 = vst.msk [vmem:[%s3514_s21 + $0xb0] sm:$0xff] %vm185_vm0, %v1362_v11 }
 0x3b6   : > { %v1308_v38 = vpop.permute.xlu0 %1307 }
 0x3b7   : > { %v1349_v40 = vadd.f32 %v1308_v38, %v1253_v54 }
 0x3b9   : > { %v1365_v43 = vmax.f32 %v1349_v40, 0.0 }
 0x3bb   : > { %2117 = vst.msk [vmem:[%s3514_s21 + $0xc8] sm:$0xff] %vm185_vm0, %v1365_v43 }
 0x3be   : > { %v1323_v13 = vpop.permute.xlu0 %1322 }
 0x3bf   : > { %v1352_v35 = vadd.f32 %v1323_v13, %v1256_v14 }
 0x3c1   : > { %v1368_v42 = vmax.f32 %v1352_v35, 0.0 }
 0x3c3   : > { %2120 = vst.msk [vmem:[%s3514_s21 + $0xe0] sm:$0xff] %vm185_vm0, %v1368_v42 }
 0x3c6   : > { %v1338_v17 = vpop.permute.xlu0 %1337 }
 0x3c7   : > { %v1355_v53 = vadd.f32 %v1338_v17, %v1259_v26 }
 0x3c9   : > { %v1371_v6 = vmax.f32 %v1355_v53, 0.0 }
 0x3cb   : > { %2123 = vst.msk [vmem:[%s3514_s21 + $0xf8] sm:$0xff] %vm185_vm0, %v1371_v6 }
 0x3ce   : > { %v1874_v28 = vpop.permute.xlu0 %1873 }
 0x3cf   : > { %v1951_v18 = vadd.f32 %v1874_v28, %v1855_v21 }
 0x3d1   : > { %v1967_v22 = vmax.f32 %v1951_v18, 0.0 }
 0x3d3   : > { %2156 = vst.msk [vmem:[%s3514_s21 + $0x100] sm:$0xff] %vm185_vm0, %v1967_v22 }
 0x3d6   : > { %v1899_v9 = vpop.permute.xlu0 %1898 }
 0x3d7   : > { %v1956_v12 = vadd.f32 %v1899_v9, %v1860_v7 }
 0x3d9   : > { %v1972_v27 = vmax.f32 %v1956_v12, 0.0 }
 0x3db   : > { %2161 = vst.msk [vmem:[%s3514_s21 + $0x128] sm:$0xff] %vm185_vm0, %v1972_v27 }
 0x3de   : > { %v1914_v33 = vpop.permute.xlu0 %1913 }
 0x3df   : > { %v1959_v16 = vadd.f32 %v1914_v33, %v1863_v56 }
 0x3e1   : > { %v1975_v60 = vmax.f32 %v1959_v16, 0.0 }
 0x3e3   : > { %2164 = vst.msk [vmem:[%s3514_s21 + $0x140] sm:$0xff] %vm185_vm0, %v1975_v60 }
 0x3e6   : > { %v1929_v49 = vpop.permute.xlu0 %1928 }
 0x3e7   : > { %v1962_v51 = vadd.f32 %v1929_v49, %v1866_v52 }
 0x3e9   : > { %v1978_v25 = vmax.f32 %v1962_v51, 0.0 }
 0x3eb   : > { %2167 = vst.msk [vmem:[%s3514_s21 + $0x158] sm:$0xff] %vm185_vm0, %v1978_v25 }
 0x3ee   : > { %v1944_v24 = vpop.permute.xlu0 %1943 }
 0x3ef   : > { %v1965_v20 = vadd.f32 %v1944_v24, %v1869_v23 }
 0x3f1   : > { %v1981_v36 = vmax.f32 %v1965_v20, 0.0 }
 0x3f3   : > { %2170 = vst.msk [vmem:[%s3514_s21 + $0x170] sm:$0xff] %vm185_vm0, %v1981_v36 }
 0x3f4 PF: > { %s12_s9 = sadd.s32 1, %s2310_s9  }
 0x3f5   : > { %p9_p4 = scmp.ge.s32.totalorder %s12_s9, 4  }
 0x3f7   :  { %11 = sbr.rel (!%p9_p4) target bundleno = 1 (0x1), region = 67 }

</bundles_post_ra>
